<compile_context>
chip_gen: v6e
topology: v6e:2x2x1
jax: 0.10.0
libtpu: 0.0.40
codegen_flags: <defaults>
</compile_context>

<pallas_src>
import jax
import jax.numpy as jnp
from jax import lax
from jax.experimental import pallas as pl
from jax.experimental.pallas import tpu as pltpu
import numpy as np

LEAK = 0.01          # F.leaky_relu_ default negative_slope
BN_EPS = 1e-5        # nn.BatchNorm2d default eps


# ------------------------------------------------------------------ fused kernel

def _res_double_conv_kernel(x_ref,
                            w11_ref, s11_ref, b11_ref,
                            w12_ref, s12_ref, b12_ref,
                            wsk_ref, bsk_ref,
                            w21_ref, s21_ref, b21_ref,
                            w22_ref, s22_ref, b22_ref,
                            o_ref):
    """Whole ResDoubleConv for one batch image, activations in (H, W*C) lane-dense layout."""

    def lrelu(v):
        return jnp.where(v > 0, v, LEAK * v)

    def conv3x3(a, w_ref):
        # a: (H, W*Cin) value. w_ref: (3, W*Cin, W*Cout) banded weights (dx folded in).
        # dy handled by zero-row shifted operands -> 3 MXU matmuls, f32 accumulation.
        H = a.shape[0]
        z = jnp.zeros((1, a.shape[1]), jnp.float32)
        up = jnp.concatenate([z, a[:H - 1, :]], axis=0)   # row h holds a[h-1]
        dn = jnp.concatenate([a[1:, :], z], axis=0)       # row h holds a[h+1]
        return (jnp.dot(up, w_ref[0], preferred_element_type=jnp.float32)
                + jnp.dot(a,  w_ref[1], preferred_element_type=jnp.float32)
                + jnp.dot(dn, w_ref[2], preferred_element_type=jnp.float32))

    x = x_ref[0]                                           # (H, W*Cin)

    # ---- residual block 1 (projection skip: 1x1 conv with bias)
    t = lrelu(conv3x3(x, w11_ref) * s11_ref[...] + b11_ref[...])
    t = lrelu(conv3x3(t, w12_ref) * s12_ref[...] + b12_ref[...])
    skip = jnp.dot(x, wsk_ref[...], preferred_element_type=jnp.float32) + bsk_ref[...]
    r = lrelu(skip + t)                                    # (H, W*Cout)

    # ---- residual block 2 (identity skip)
    t = lrelu(conv3x3(r, w21_ref) * s21_ref[...] + b21_ref[...])
    t = lrelu(conv3x3(t, w22_ref) * s22_ref[...] + b22_ref[...])
    o_ref[0] = lrelu(r + t)                                # lane-dense (H, W*Cout) store


# ------------------------------------------------------------------ weight repacking

def _band_conv3x3(w_hwio, W):
    """(3,3,Cin,Cout) HWIO -> (3, W*Cin, W*Cout): per-dy banded matrices.

    M_dy[w_in*Cin+ci, w_out*Cout+co] = w[dy, w_in-w_out+1, ci, co] when the dx tap is in
    range (W-padding handled by zeroing out-of-range taps)."""
    _, _, Cin, Cout = w_hwio.shape
    w_in = jnp.arange(W)[:, None]
    w_out = jnp.arange(W)[None, :]
    dx = w_in - w_out + 1                                   # (W, W)
    valid = ((dx >= 0) & (dx <= 2)).astype(w_hwio.dtype)[:, :, None, None]
    dx_c = jnp.clip(dx, 0, 2)
    mats = []
    for dy in range(3):
        blk = w_hwio[dy][dx_c] * valid                      # (W, W, Cin, Cout)
        mats.append(blk.transpose(0, 2, 1, 3).reshape(W * Cin, W * Cout))
    return jnp.stack(mats, axis=0)


def _block_diag_1x1(w_io, W):
    """(Cin, Cout) 1x1 weight -> block-diagonal (W*Cin, W*Cout)."""
    Cin, Cout = w_io.shape
    eye = jnp.eye(W, dtype=w_io.dtype)[:, :, None, None]
    blk = eye * w_io[None, None]
    return blk.transpose(0, 2, 1, 3).reshape(W * Cin, W * Cout)


def _fold_bn(gamma, beta, mean, var):
    scale = gamma / jnp.sqrt(var + BN_EPS)
    bias = beta - mean * scale
    return scale, bias


# ------------------------------------------------------------------ wrapper

def res_double_conv_fwd(x_nchw, params):
    N, Cin, H, W = x_nchw.shape
    p1, p2 = params["block1"], params["block2"]
    Cout = p1["w1"].shape[-1]
    WC = W * Cout

    # NCHW (PyTorch) -> lane-dense (N, H, W*Cin)
    x2d = jnp.transpose(x_nchw, (0, 2, 3, 1)).astype(jnp.float32).reshape(N, H, W * Cin)

    def fold_tiled(bn):
        s, b = _fold_bn(*bn)
        return jnp.tile(s, W).reshape(1, WC), jnp.tile(b, W).reshape(1, WC)

    w11 = _band_conv3x3(p1["w1"], W); s11, b11 = fold_tiled(p1["bn1"])
    w12 = _band_conv3x3(p1["w2"], W); s12, b12 = fold_tiled(p1["bn2"])
    w21 = _band_conv3x3(p2["w1"], W); s21, b21 = fold_tiled(p2["bn1"])
    w22 = _band_conv3x3(p2["w2"], W); s22, b22 = fold_tiled(p2["bn2"])
    if "w3" in p1:   # projection skip (in_channels != out_channels)
        wsk = _block_diag_1x1(p1["w3"], W)
        bsk = jnp.tile(p1["b3"], W).reshape(1, WC)
    else:            # identity skip
        wsk = _block_diag_1x1(jnp.eye(Cin, Cout, dtype=jnp.float32), W)
        bsk = jnp.zeros((1, WC), jnp.float32)

    def full_spec(shape):
        return pl.BlockSpec(shape, lambda *_: (0,) * len(shape))

    out2d = pl.pallas_call(
        _res_double_conv_kernel,
        out_shape=jax.ShapeDtypeStruct((N, H, WC), jnp.float32),
        grid=(N,),
        in_specs=[
            pl.BlockSpec((1, H, W * Cin), lambda n: (n, 0, 0)),
            full_spec((3, W * Cin, WC)), full_spec((1, WC)), full_spec((1, WC)),
            full_spec((3, WC, WC)), full_spec((1, WC)), full_spec((1, WC)),
            full_spec((W * Cin, WC)), full_spec((1, WC)),
            full_spec((3, WC, WC)), full_spec((1, WC)), full_spec((1, WC)),
            full_spec((3, WC, WC)), full_spec((1, WC)), full_spec((1, WC)),
        ],
        out_specs=pl.BlockSpec((1, H, WC), lambda n: (n, 0, 0)),
        compiler_params=pltpu.CompilerParams(
            dimension_semantics=("parallel",)),
    )(x2d, w11, s11, b11, w12, s12, b12, wsk, bsk,
      w21, s21, b21, w22, s22, b22)

    # (N, H, W*Cout) -> NCHW
    return jnp.transpose(out2d.reshape(N, H, W, Cout), (0, 3, 1, 2))


# ------------------------------------------------------------------ params

def make_params(key, cin, cout):
    ks = list(jax.random.split(key, 16))

    def conv_w(k, kh, kw, ci, co):  # HWIO
        return jax.random.normal(k, (kh, kw, ci, co), jnp.float32) * 0.1

    def bn(k, c):
        k1, k2, k3, k4 = jax.random.split(k, 4)
        gamma = 1.0 + 0.1 * jax.random.normal(k1, (c,), jnp.float32)
        beta = 0.1 * jax.random.normal(k2, (c,), jnp.float32)
        mean = 0.1 * jax.random.normal(k3, (c,), jnp.float32)
        var = 1.0 + 0.1 * jnp.abs(jax.random.normal(k4, (c,), jnp.float32))
        return (gamma, beta, mean, var)

    block1 = {
        "w1": conv_w(ks[0], 3, 3, cin, cout),
        "bn1": bn(ks[1], cout),
        "w2": conv_w(ks[2], 3, 3, cout, cout),
        "bn2": bn(ks[3], cout),
    }
    if cin != cout:
        block1["w3"] = conv_w(ks[4], 1, 1, cin, cout)[0, 0]    # (Cin, Cout) 1x1
        block1["b3"] = 0.1 * jax.random.normal(ks[5], (cout,), jnp.float32)
    block2 = {
        "w1": conv_w(ks[6], 3, 3, cout, cout),
        "bn1": bn(ks[7], cout),
        "w2": conv_w(ks[8], 3, 3, cout, cout),
        "bn2": bn(ks[9], cout),
    }
    return {"block1": block1, "block2": block2}


# ------------------------------------------------------------------ pure-JAX reference

def _conv3x3_ref(x, w):  # x NHWC, w HWIO
    return lax.conv_general_dilated(
        x, w, window_strides=(1, 1), padding="SAME",
        dimension_numbers=("NHWC", "HWIO", "NHWC"))


def _lrelu_ref(x):
    return jnp.where(x > 0, x, LEAK * x)


def residual_block_ref(x, p, same_shape):
    s1, b1 = _fold_bn(*p["bn1"])
    s2, b2 = _fold_bn(*p["bn2"])
    out = _lrelu_ref(_conv3x3_ref(x, p["w1"]) * s1 + b1)
    out = _lrelu_ref(_conv3x3_ref(out, p["w2"]) * s2 + b2)
    skip = x if same_shape else (jnp.einsum("nhwc,co->nhwo", x, p["w3"]) + p["b3"])
    return _lrelu_ref(skip + out)


def res_double_conv_ref(x_nchw, params):
    x = jnp.transpose(x_nchw, (0, 2, 3, 1)).astype(jnp.float32)
    x = residual_block_ref(x, params["block1"], same_shape="w3" not in params["block1"])
    x = residual_block_ref(x, params["block2"], same_shape=True)
    return jnp.transpose(x, (0, 3, 1, 2))


# ------------------------------------------------------------------ main

if __name__ == "__main__":
    key = jax.random.PRNGKey(0)
    k_x, k_p = jax.random.split(key)

    N, C_IN, C_OUT, H, W = 2, 4, 8, 16, 16
    x = jax.random.normal(k_x, (N, C_IN, H, W), jnp.float32)   # NCHW like PyTorch
    params = make_params(k_p, C_IN, C_OUT)

    fwd = jax.jit(res_double_conv_fwd)
    y = jax.block_until_ready(fwd(x, params))

    y_ref = jax.block_until_ready(res_double_conv_ref(x, params))
    assert y.shape == (N, C_OUT, H, W)
    np.testing.assert_allclose(np.asarray(y), np.asarray(y_ref),
                               rtol=2e-4, atol=2e-4)
    print("KERNEL_OK")
</pallas_src>

<mosaic_0001>
module attributes {stable_mosaic.version = 11 : i64} {
  func.func @_res_double_conv_kernel(%arg0: i32, %arg1: memref<1x16x64xf32, #tpu.memory_space<vmem>>, %arg2: memref<3x64x128xf32, #tpu.memory_space<vmem>>, %arg3: memref<1x128xf32, #tpu.memory_space<vmem>>, %arg4: memref<1x128xf32, #tpu.memory_space<vmem>>, %arg5: memref<3x128x128xf32, #tpu.memory_space<vmem>>, %arg6: memref<1x128xf32, #tpu.memory_space<vmem>>, %arg7: memref<1x128xf32, #tpu.memory_space<vmem>>, %arg8: memref<64x128xf32, #tpu.memory_space<vmem>>, %arg9: memref<1x128xf32, #tpu.memory_space<vmem>>, %arg10: memref<3x128x128xf32, #tpu.memory_space<vmem>>, %arg11: memref<1x128xf32, #tpu.memory_space<vmem>>, %arg12: memref<1x128xf32, #tpu.memory_space<vmem>>, %arg13: memref<3x128x128xf32, #tpu.memory_space<vmem>>, %arg14: memref<1x128xf32, #tpu.memory_space<vmem>>, %arg15: memref<1x128xf32, #tpu.memory_space<vmem>>, %arg16: memref<1x16x128xf32, #tpu.memory_space<vmem>>) attributes {dimension_semantics = [#tpu.dimension_semantics<parallel>], iteration_bounds = array<i64: 2>, scalar_prefetch = 0 : i64, scratch_operands = 0 : i64, tpu.core_type = #tpu.core_type<tc>, window_params = [{transform_indices = @transform_0, window_bounds = array<i64: 1, 16, 64>}, {pipeline_mode = #tpu.pipeline_mode<synchronous>, transform_indices = @transform_1, window_bounds = array<i64: 3, 64, 128>}, {pipeline_mode = #tpu.pipeline_mode<synchronous>, transform_indices = @transform_2, window_bounds = array<i64: 1, 128>}, {pipeline_mode = #tpu.pipeline_mode<synchronous>, transform_indices = @transform_3, window_bounds = array<i64: 1, 128>}, {pipeline_mode = #tpu.pipeline_mode<synchronous>, transform_indices = @transform_4, window_bounds = array<i64: 3, 128, 128>}, {pipeline_mode = #tpu.pipeline_mode<synchronous>, transform_indices = @transform_5, window_bounds = array<i64: 1, 128>}, {pipeline_mode = #tpu.pipeline_mode<synchronous>, transform_indices = @transform_6, window_bounds = array<i64: 1, 128>}, {pipeline_mode = #tpu.pipeline_mode<synchronous>, transform_indices = @transform_7, window_bounds = array<i64: 64, 128>}, {pipeline_mode = #tpu.pipeline_mode<synchronous>, transform_indices = @transform_8, window_bounds = array<i64: 1, 128>}, {pipeline_mode = #tpu.pipeline_mode<synchronous>, transform_indices = @transform_9, window_bounds = array<i64: 3, 128, 128>}, {pipeline_mode = #tpu.pipeline_mode<synchronous>, transform_indices = @transform_10, window_bounds = array<i64: 1, 128>}, {pipeline_mode = #tpu.pipeline_mode<synchronous>, transform_indices = @transform_11, window_bounds = array<i64: 1, 128>}, {pipeline_mode = #tpu.pipeline_mode<synchronous>, transform_indices = @transform_12, window_bounds = array<i64: 3, 128, 128>}, {pipeline_mode = #tpu.pipeline_mode<synchronous>, transform_indices = @transform_13, window_bounds = array<i64: 1, 128>}, {pipeline_mode = #tpu.pipeline_mode<synchronous>, transform_indices = @transform_14, window_bounds = array<i64: 1, 128>}, {transform_indices = @transform_15, window_bounds = array<i64: 1, 16, 128>}]} {
    %c0 = arith.constant 0 : index
    %c0_0 = arith.constant 0 : index
    %c0_1 = arith.constant 0 : index
    %0 = vector.load %arg1[%c0, %c0_0, %c0_1] : memref<1x16x64xf32, #tpu.memory_space<vmem>>, vector<1x16x64xf32>
    %1 = vector.shape_cast %0 : vector<1x16x64xf32> to vector<16x64xf32>
    %cst = arith.constant 0.000000e+00 : f32
    %2 = vector.broadcast %cst : f32 to vector<1x64xf32>
    %3 = vector.extract_strided_slice %1 {offsets = [0, 0], sizes = [15, 64], strides = [1, 1]} : vector<16x64xf32> to vector<15x64xf32>
    %4 = tpu.concatenate %2, %3 in 0 : vector<1x64xf32>, vector<15x64xf32> -> vector<16x64xf32>
    %5 = vector.extract_strided_slice %1 {offsets = [1, 0], sizes = [15, 64], strides = [1, 1]} : vector<16x64xf32> to vector<15x64xf32>
    %6 = tpu.concatenate %5, %2 in 0 : vector<15x64xf32>, vector<1x64xf32> -> vector<16x64xf32>
    %c0_2 = arith.constant 0 : index
    %c0_3 = arith.constant 0 : index
    %c0_4 = arith.constant 0 : index
    %7 = vector.load %arg2[%c0_2, %c0_3, %c0_4] : memref<3x64x128xf32, #tpu.memory_space<vmem>>, vector<1x64x128xf32>
    %8 = vector.shape_cast %7 : vector<1x64x128xf32> to vector<64x128xf32>
    %cst_5 = arith.constant dense<0.000000e+00> : vector<16x128xf32>
    %9 = tpu.matmul %4, %8, %cst_5 {dimension_numbers = #tpu.dot_dimension_numbers<[1], [0], [0], [1], [0, 0, 1, 1], [], []>} : vector<16x64xf32>, vector<64x128xf32>, vector<16x128xf32> -> vector<16x128xf32>
    %c1 = arith.constant 1 : index
    %c0_6 = arith.constant 0 : index
    %c0_7 = arith.constant 0 : index
    %10 = vector.load %arg2[%c1, %c0_6, %c0_7] : memref<3x64x128xf32, #tpu.memory_space<vmem>>, vector<1x64x128xf32>
    %11 = vector.shape_cast %10 : vector<1x64x128xf32> to vector<64x128xf32>
    %cst_8 = arith.constant dense<0.000000e+00> : vector<16x128xf32>
    %12 = tpu.matmul %1, %11, %cst_8 {dimension_numbers = #tpu.dot_dimension_numbers<[1], [0], [0], [1], [0, 0, 1, 1], [], []>} : vector<16x64xf32>, vector<64x128xf32>, vector<16x128xf32> -> vector<16x128xf32>
    %13 = arith.addf %9, %12 : vector<16x128xf32>
    %c2 = arith.constant 2 : index
    %c0_9 = arith.constant 0 : index
    %c0_10 = arith.constant 0 : index
    %14 = vector.load %arg2[%c2, %c0_9, %c0_10] : memref<3x64x128xf32, #tpu.memory_space<vmem>>, vector<1x64x128xf32>
    %15 = vector.shape_cast %14 : vector<1x64x128xf32> to vector<64x128xf32>
    %cst_11 = arith.constant dense<0.000000e+00> : vector<16x128xf32>
    %16 = tpu.matmul %6, %15, %cst_11 {dimension_numbers = #tpu.dot_dimension_numbers<[1], [0], [0], [1], [0, 0, 1, 1], [], []>} : vector<16x64xf32>, vector<64x128xf32>, vector<16x128xf32> -> vector<16x128xf32>
    %17 = arith.addf %13, %16 : vector<16x128xf32>
    %c0_12 = arith.constant 0 : index
    %c0_13 = arith.constant 0 : index
    %18 = vector.load %arg3[%c0_12, %c0_13] : memref<1x128xf32, #tpu.memory_space<vmem>>, vector<1x128xf32>
    %19 = vector.broadcast %18 : vector<1x128xf32> to vector<16x128xf32>
    %20 = arith.mulf %17, %19 : vector<16x128xf32>
    %c0_14 = arith.constant 0 : index
    %c0_15 = arith.constant 0 : index
    %21 = vector.load %arg4[%c0_14, %c0_15] : memref<1x128xf32, #tpu.memory_space<vmem>>, vector<1x128xf32>
    %22 = vector.broadcast %21 : vector<1x128xf32> to vector<16x128xf32>
    %23 = arith.addf %20, %22 : vector<16x128xf32>
    %cst_16 = arith.constant 0.000000e+00 : f32
    %24 = vector.broadcast %cst_16 : f32 to vector<16x128xf32>
    %25 = arith.cmpf ogt, %23, %24 : vector<16x128xf32>
    %cst_17 = arith.constant 0.00999999977 : f32
    %26 = vector.broadcast %cst_17 : f32 to vector<16x128xf32>
    %27 = arith.mulf %26, %23 : vector<16x128xf32>
    %28 = arith.select %25, %23, %27 : vector<16x128xi1>, vector<16x128xf32>
    %cst_18 = arith.constant 0.000000e+00 : f32
    %29 = vector.broadcast %cst_18 : f32 to vector<1x128xf32>
    %30 = vector.extract_strided_slice %28 {offsets = [0, 0], sizes = [15, 128], strides = [1, 1]} : vector<16x128xf32> to vector<15x128xf32>
    %31 = tpu.concatenate %29, %30 in 0 : vector<1x128xf32>, vector<15x128xf32> -> vector<16x128xf32>
    %32 = vector.extract_strided_slice %28 {offsets = [1, 0], sizes = [15, 128], strides = [1, 1]} : vector<16x128xf32> to vector<15x128xf32>
    %33 = tpu.concatenate %32, %29 in 0 : vector<15x128xf32>, vector<1x128xf32> -> vector<16x128xf32>
    %c0_19 = arith.constant 0 : index
    %c0_20 = arith.constant 0 : index
    %c0_21 = arith.constant 0 : index
    %34 = vector.load %arg5[%c0_19, %c0_20, %c0_21] : memref<3x128x128xf32, #tpu.memory_space<vmem>>, vector<1x128x128xf32>
    %35 = vector.shape_cast %34 : vector<1x128x128xf32> to vector<128x128xf32>
    %cst_22 = arith.constant dense<0.000000e+00> : vector<16x128xf32>
    %36 = tpu.matmul %31, %35, %cst_22 {dimension_numbers = #tpu.dot_dimension_numbers<[1], [0], [0], [1], [0, 0, 1, 1], [], []>} : vector<16x128xf32>, vector<128x128xf32>, vector<16x128xf32> -> vector<16x128xf32>
    %c1_23 = arith.constant 1 : index
    %c0_24 = arith.constant 0 : index
    %c0_25 = arith.constant 0 : index
    %37 = vector.load %arg5[%c1_23, %c0_24, %c0_25] : memref<3x128x128xf32, #tpu.memory_space<vmem>>, vector<1x128x128xf32>
    %38 = vector.shape_cast %37 : vector<1x128x128xf32> to vector<128x128xf32>
    %cst_26 = arith.constant dense<0.000000e+00> : vector<16x128xf32>
    %39 = tpu.matmul %28, %38, %cst_26 {dimension_numbers = #tpu.dot_dimension_numbers<[1], [0], [0], [1], [0, 0, 1, 1], [], []>} : vector<16x128xf32>, vector<128x128xf32>, vector<16x128xf32> -> vector<16x128xf32>
    %40 = arith.addf %36, %39 : vector<16x128xf32>
    %c2_27 = arith.constant 2 : index
    %c0_28 = arith.constant 0 : index
    %c0_29 = arith.constant 0 : index
    %41 = vector.load %arg5[%c2_27, %c0_28, %c0_29] : memref<3x128x128xf32, #tpu.memory_space<vmem>>, vector<1x128x128xf32>
    %42 = vector.shape_cast %41 : vector<1x128x128xf32> to vector<128x128xf32>
    %cst_30 = arith.constant dense<0.000000e+00> : vector<16x128xf32>
    %43 = tpu.matmul %33, %42, %cst_30 {dimension_numbers = #tpu.dot_dimension_numbers<[1], [0], [0], [1], [0, 0, 1, 1], [], []>} : vector<16x128xf32>, vector<128x128xf32>, vector<16x128xf32> -> vector<16x128xf32>
    %44 = arith.addf %40, %43 : vector<16x128xf32>
    %c0_31 = arith.constant 0 : index
    %c0_32 = arith.constant 0 : index
    %45 = vector.load %arg6[%c0_31, %c0_32] : memref<1x128xf32, #tpu.memory_space<vmem>>, vector<1x128xf32>
    %46 = vector.broadcast %45 : vector<1x128xf32> to vector<16x128xf32>
    %47 = arith.mulf %44, %46 : vector<16x128xf32>
    %c0_33 = arith.constant 0 : index
    %c0_34 = arith.constant 0 : index
    %48 = vector.load %arg7[%c0_33, %c0_34] : memref<1x128xf32, #tpu.memory_space<vmem>>, vector<1x128xf32>
    %49 = vector.broadcast %48 : vector<1x128xf32> to vector<16x128xf32>
    %50 = arith.addf %47, %49 : vector<16x128xf32>
    %cst_35 = arith.constant 0.000000e+00 : f32
    %51 = vector.broadcast %cst_35 : f32 to vector<16x128xf32>
    %52 = arith.cmpf ogt, %50, %51 : vector<16x128xf32>
    %cst_36 = arith.constant 0.00999999977 : f32
    %53 = vector.broadcast %cst_36 : f32 to vector<16x128xf32>
    %54 = arith.mulf %53, %50 : vector<16x128xf32>
    %55 = arith.select %52, %50, %54 : vector<16x128xi1>, vector<16x128xf32>
    %c0_37 = arith.constant 0 : index
    %c0_38 = arith.constant 0 : index
    %56 = vector.load %arg8[%c0_37, %c0_38] : memref<64x128xf32, #tpu.memory_space<vmem>>, vector<64x128xf32>
    %cst_39 = arith.constant dense<0.000000e+00> : vector<16x128xf32>
    %57 = tpu.matmul %1, %56, %cst_39 {dimension_numbers = #tpu.dot_dimension_numbers<[1], [0], [0], [1], [0, 0, 1, 1], [], []>} : vector<16x64xf32>, vector<64x128xf32>, vector<16x128xf32> -> vector<16x128xf32>
    %c0_40 = arith.constant 0 : index
    %c0_41 = arith.constant 0 : index
    %58 = vector.load %arg9[%c0_40, %c0_41] : memref<1x128xf32, #tpu.memory_space<vmem>>, vector<1x128xf32>
    %59 = vector.broadcast %58 : vector<1x128xf32> to vector<16x128xf32>
    %60 = arith.addf %57, %59 : vector<16x128xf32>
    %61 = arith.addf %60, %55 : vector<16x128xf32>
    %cst_42 = arith.constant 0.000000e+00 : f32
    %62 = vector.broadcast %cst_42 : f32 to vector<16x128xf32>
    %63 = arith.cmpf ogt, %61, %62 : vector<16x128xf32>
    %cst_43 = arith.constant 0.00999999977 : f32
    %64 = vector.broadcast %cst_43 : f32 to vector<16x128xf32>
    %65 = arith.mulf %64, %61 : vector<16x128xf32>
    %66 = arith.select %63, %61, %65 : vector<16x128xi1>, vector<16x128xf32>
    %cst_44 = arith.constant 0.000000e+00 : f32
    %67 = vector.broadcast %cst_44 : f32 to vector<1x128xf32>
    %68 = vector.extract_strided_slice %66 {offsets = [0, 0], sizes = [15, 128], strides = [1, 1]} : vector<16x128xf32> to vector<15x128xf32>
    %69 = tpu.concatenate %67, %68 in 0 : vector<1x128xf32>, vector<15x128xf32> -> vector<16x128xf32>
    %70 = vector.extract_strided_slice %66 {offsets = [1, 0], sizes = [15, 128], strides = [1, 1]} : vector<16x128xf32> to vector<15x128xf32>
    %71 = tpu.concatenate %70, %67 in 0 : vector<15x128xf32>, vector<1x128xf32> -> vector<16x128xf32>
    %c0_45 = arith.constant 0 : index
    %c0_46 = arith.constant 0 : index
    %c0_47 = arith.constant 0 : index
    %72 = vector.load %arg10[%c0_45, %c0_46, %c0_47] : memref<3x128x128xf32, #tpu.memory_space<vmem>>, vector<1x128x128xf32>
    %73 = vector.shape_cast %72 : vector<1x128x128xf32> to vector<128x128xf32>
    %cst_48 = arith.constant dense<0.000000e+00> : vector<16x128xf32>
    %74 = tpu.matmul %69, %73, %cst_48 {dimension_numbers = #tpu.dot_dimension_numbers<[1], [0], [0], [1], [0, 0, 1, 1], [], []>} : vector<16x128xf32>, vector<128x128xf32>, vector<16x128xf32> -> vector<16x128xf32>
    %c1_49 = arith.constant 1 : index
    %c0_50 = arith.constant 0 : index
    %c0_51 = arith.constant 0 : index
    %75 = vector.load %arg10[%c1_49, %c0_50, %c0_51] : memref<3x128x128xf32, #tpu.memory_space<vmem>>, vector<1x128x128xf32>
    %76 = vector.shape_cast %75 : vector<1x128x128xf32> to vector<128x128xf32>
    %cst_52 = arith.constant dense<0.000000e+00> : vector<16x128xf32>
    %77 = tpu.matmul %66, %76, %cst_52 {dimension_numbers = #tpu.dot_dimension_numbers<[1], [0], [0], [1], [0, 0, 1, 1], [], []>} : vector<16x128xf32>, vector<128x128xf32>, vector<16x128xf32> -> vector<16x128xf32>
    %78 = arith.addf %74, %77 : vector<16x128xf32>
    %c2_53 = arith.constant 2 : index
    %c0_54 = arith.constant 0 : index
    %c0_55 = arith.constant 0 : index
    %79 = vector.load %arg10[%c2_53, %c0_54, %c0_55] : memref<3x128x128xf32, #tpu.memory_space<vmem>>, vector<1x128x128xf32>
    %80 = vector.shape_cast %79 : vector<1x128x128xf32> to vector<128x128xf32>
    %cst_56 = arith.constant dense<0.000000e+00> : vector<16x128xf32>
    %81 = tpu.matmul %71, %80, %cst_56 {dimension_numbers = #tpu.dot_dimension_numbers<[1], [0], [0], [1], [0, 0, 1, 1], [], []>} : vector<16x128xf32>, vector<128x128xf32>, vector<16x128xf32> -> vector<16x128xf32>
    %82 = arith.addf %78, %81 : vector<16x128xf32>
    %c0_57 = arith.constant 0 : index
    %c0_58 = arith.constant 0 : index
    %83 = vector.load %arg11[%c0_57, %c0_58] : memref<1x128xf32, #tpu.memory_space<vmem>>, vector<1x128xf32>
    %84 = vector.broadcast %83 : vector<1x128xf32> to vector<16x128xf32>
    %85 = arith.mulf %82, %84 : vector<16x128xf32>
    %c0_59 = arith.constant 0 : index
    %c0_60 = arith.constant 0 : index
    %86 = vector.load %arg12[%c0_59, %c0_60] : memref<1x128xf32, #tpu.memory_space<vmem>>, vector<1x128xf32>
    %87 = vector.broadcast %86 : vector<1x128xf32> to vector<16x128xf32>
    %88 = arith.addf %85, %87 : vector<16x128xf32>
    %cst_61 = arith.constant 0.000000e+00 : f32
    %89 = vector.broadcast %cst_61 : f32 to vector<16x128xf32>
    %90 = arith.cmpf ogt, %88, %89 : vector<16x128xf32>
    %cst_62 = arith.constant 0.00999999977 : f32
    %91 = vector.broadcast %cst_62 : f32 to vector<16x128xf32>
    %92 = arith.mulf %91, %88 : vector<16x128xf32>
    %93 = arith.select %90, %88, %92 : vector<16x128xi1>, vector<16x128xf32>
    %cst_63 = arith.constant 0.000000e+00 : f32
    %94 = vector.broadcast %cst_63 : f32 to vector<1x128xf32>
    %95 = vector.extract_strided_slice %93 {offsets = [0, 0], sizes = [15, 128], strides = [1, 1]} : vector<16x128xf32> to vector<15x128xf32>
    %96 = tpu.concatenate %94, %95 in 0 : vector<1x128xf32>, vector<15x128xf32> -> vector<16x128xf32>
    %97 = vector.extract_strided_slice %93 {offsets = [1, 0], sizes = [15, 128], strides = [1, 1]} : vector<16x128xf32> to vector<15x128xf32>
    %98 = tpu.concatenate %97, %94 in 0 : vector<15x128xf32>, vector<1x128xf32> -> vector<16x128xf32>
    %c0_64 = arith.constant 0 : index
    %c0_65 = arith.constant 0 : index
    %c0_66 = arith.constant 0 : index
    %99 = vector.load %arg13[%c0_64, %c0_65, %c0_66] : memref<3x128x128xf32, #tpu.memory_space<vmem>>, vector<1x128x128xf32>
    %100 = vector.shape_cast %99 : vector<1x128x128xf32> to vector<128x128xf32>
    %cst_67 = arith.constant dense<0.000000e+00> : vector<16x128xf32>
    %101 = tpu.matmul %96, %100, %cst_67 {dimension_numbers = #tpu.dot_dimension_numbers<[1], [0], [0], [1], [0, 0, 1, 1], [], []>} : vector<16x128xf32>, vector<128x128xf32>, vector<16x128xf32> -> vector<16x128xf32>
    %c1_68 = arith.constant 1 : index
    %c0_69 = arith.constant 0 : index
    %c0_70 = arith.constant 0 : index
    %102 = vector.load %arg13[%c1_68, %c0_69, %c0_70] : memref<3x128x128xf32, #tpu.memory_space<vmem>>, vector<1x128x128xf32>
    %103 = vector.shape_cast %102 : vector<1x128x128xf32> to vector<128x128xf32>
    %cst_71 = arith.constant dense<0.000000e+00> : vector<16x128xf32>
    %104 = tpu.matmul %93, %103, %cst_71 {dimension_numbers = #tpu.dot_dimension_numbers<[1], [0], [0], [1], [0, 0, 1, 1], [], []>} : vector<16x128xf32>, vector<128x128xf32>, vector<16x128xf32> -> vector<16x128xf32>
    %105 = arith.addf %101, %104 : vector<16x128xf32>
    %c2_72 = arith.constant 2 : index
    %c0_73 = arith.constant 0 : index
    %c0_74 = arith.constant 0 : index
    %106 = vector.load %arg13[%c2_72, %c0_73, %c0_74] : memref<3x128x128xf32, #tpu.memory_space<vmem>>, vector<1x128x128xf32>
    %107 = vector.shape_cast %106 : vector<1x128x128xf32> to vector<128x128xf32>
    %cst_75 = arith.constant dense<0.000000e+00> : vector<16x128xf32>
    %108 = tpu.matmul %98, %107, %cst_75 {dimension_numbers = #tpu.dot_dimension_numbers<[1], [0], [0], [1], [0, 0, 1, 1], [], []>} : vector<16x128xf32>, vector<128x128xf32>, vector<16x128xf32> -> vector<16x128xf32>
    %109 = arith.addf %105, %108 : vector<16x128xf32>
    %c0_76 = arith.constant 0 : index
    %c0_77 = arith.constant 0 : index
    %110 = vector.load %arg14[%c0_76, %c0_77] : memref<1x128xf32, #tpu.memory_space<vmem>>, vector<1x128xf32>
    %111 = vector.broadcast %110 : vector<1x128xf32> to vector<16x128xf32>
    %112 = arith.mulf %109, %111 : vector<16x128xf32>
    %c0_78 = arith.constant 0 : index
    %c0_79 = arith.constant 0 : index
    %113 = vector.load %arg15[%c0_78, %c0_79] : memref<1x128xf32, #tpu.memory_space<vmem>>, vector<1x128xf32>
    %114 = vector.broadcast %113 : vector<1x128xf32> to vector<16x128xf32>
    %115 = arith.addf %112, %114 : vector<16x128xf32>
    %cst_80 = arith.constant 0.000000e+00 : f32
    %116 = vector.broadcast %cst_80 : f32 to vector<16x128xf32>
    %117 = arith.cmpf ogt, %115, %116 : vector<16x128xf32>
    %cst_81 = arith.constant 0.00999999977 : f32
    %118 = vector.broadcast %cst_81 : f32 to vector<16x128xf32>
    %119 = arith.mulf %118, %115 : vector<16x128xf32>
    %120 = arith.select %117, %115, %119 : vector<16x128xi1>, vector<16x128xf32>
    %121 = arith.addf %66, %120 : vector<16x128xf32>
    %cst_82 = arith.constant 0.000000e+00 : f32
    %122 = vector.broadcast %cst_82 : f32 to vector<16x128xf32>
    %123 = arith.cmpf ogt, %121, %122 : vector<16x128xf32>
    %cst_83 = arith.constant 0.00999999977 : f32
    %124 = vector.broadcast %cst_83 : f32 to vector<16x128xf32>
    %125 = arith.mulf %124, %121 : vector<16x128xf32>
    %126 = arith.select %123, %121, %125 : vector<16x128xi1>, vector<16x128xf32>
    %c0_84 = arith.constant 0 : index
    %c0_85 = arith.constant 0 : index
    %c0_86 = arith.constant 0 : index
    %127 = vector.load %arg16[%c0_84, %c0_85, %c0_86] : memref<1x16x128xf32, #tpu.memory_space<vmem>>, vector<1x16x128xf32>
    %128 = vector.shape_cast %127 : vector<1x16x128xf32> to vector<16x128xf32>
    %129 = vector.shape_cast %126 : vector<16x128xf32> to vector<1x16x128xf32>
    tpu.vector_store %arg16[%c0_84, %c0_85, %c0_86], %129 {strides = array<i32>} : memref<1x16x128xf32, #tpu.memory_space<vmem>>, vector<1x16x128xf32>,
    return
  }
  func.func @transform_0(%arg0: i32) -> (i32, i32, i32) {
    %c0_i32 = arith.constant 0 : i32
    %c0_i32_0 = arith.constant 0 : i32
    %c0_i32_1 = arith.constant 0 : i32
    return %arg0, %c0_i32, %c0_i32_0 : i32, i32, i32
  }
  func.func @transform_1(%arg0: i32) -> (i32, i32, i32) {
    %c0_i32 = arith.constant 0 : i32
    %c0_i32_0 = arith.constant 0 : i32
    %c0_i32_1 = arith.constant 0 : i32
    %c0_i32_2 = arith.constant 0 : i32
    return %c0_i32, %c0_i32_0, %c0_i32_1 : i32, i32, i32
  }
  func.func @transform_2(%arg0: i32) -> (i32, i32) {
    %c0_i32 = arith.constant 0 : i32
    %c0_i32_0 = arith.constant 0 : i32
    %c0_i32_1 = arith.constant 0 : i32
    return %c0_i32, %c0_i32_0 : i32, i32
  }
  func.func @transform_3(%arg0: i32) -> (i32, i32) {
    %c0_i32 = arith.constant 0 : i32
    %c0_i32_0 = arith.constant 0 : i32
    %c0_i32_1 = arith.constant 0 : i32
    return %c0_i32, %c0_i32_0 : i32, i32
  }
  func.func @transform_4(%arg0: i32) -> (i32, i32, i32) {
    %c0_i32 = arith.constant 0 : i32
    %c0_i32_0 = arith.constant 0 : i32
    %c0_i32_1 = arith.constant 0 : i32
    %c0_i32_2 = arith.constant 0 : i32
    return %c0_i32, %c0_i32_0, %c0_i32_1 : i32, i32, i32
  }
  func.func @transform_5(%arg0: i32) -> (i32, i32) {
    %c0_i32 = arith.constant 0 : i32
    %c0_i32_0 = arith.constant 0 : i32
    %c0_i32_1 = arith.constant 0 : i32
    return %c0_i32, %c0_i32_0 : i32, i32
  }
  func.func @transform_6(%arg0: i32) -> (i32, i32) {
    %c0_i32 = arith.constant 0 : i32
    %c0_i32_0 = arith.constant 0 : i32
    %c0_i32_1 = arith.constant 0 : i32
    return %c0_i32, %c0_i32_0 : i32, i32
  }
  func.func @transform_7(%arg0: i32) -> (i32, i32) {
    %c0_i32 = arith.constant 0 : i32
    %c0_i32_0 = arith.constant 0 : i32
    %c0_i32_1 = arith.constant 0 : i32
    return %c0_i32, %c0_i32_0 : i32, i32
  }
  func.func @transform_8(%arg0: i32) -> (i32, i32) {
    %c0_i32 = arith.constant 0 : i32
    %c0_i32_0 = arith.constant 0 : i32
    %c0_i32_1 = arith.constant 0 : i32
    return %c0_i32, %c0_i32_0 : i32, i32
  }
  func.func @transform_9(%arg0: i32) -> (i32, i32, i32) {
    %c0_i32 = arith.constant 0 : i32
    %c0_i32_0 = arith.constant 0 : i32
    %c0_i32_1 = arith.constant 0 : i32
    %c0_i32_2 = arith.constant 0 : i32
    return %c0_i32, %c0_i32_0, %c0_i32_1 : i32, i32, i32
  }
  func.func @transform_10(%arg0: i32) -> (i32, i32) {
    %c0_i32 = arith.constant 0 : i32
    %c0_i32_0 = arith.constant 0 : i32
    %c0_i32_1 = arith.constant 0 : i32
    return %c0_i32, %c0_i32_0 : i32, i32
  }
  func.func @transform_11(%arg0: i32) -> (i32, i32) {
    %c0_i32 = arith.constant 0 : i32
    %c0_i32_0 = arith.constant 0 : i32
    %c0_i32_1 = arith.constant 0 : i32
    return %c0_i32, %c0_i32_0 : i32, i32
  }
  func.func @transform_12(%arg0: i32) -> (i32, i32, i32) {
    %c0_i32 = arith.constant 0 : i32
    %c0_i32_0 = arith.constant 0 : i32
    %c0_i32_1 = arith.constant 0 : i32
    %c0_i32_2 = arith.constant 0 : i32
    return %c0_i32, %c0_i32_0, %c0_i32_1 : i32, i32, i32
  }
  func.func @transform_13(%arg0: i32) -> (i32, i32) {
    %c0_i32 = arith.constant 0 : i32
    %c0_i32_0 = arith.constant 0 : i32
    %c0_i32_1 = arith.constant 0 : i32
    return %c0_i32, %c0_i32_0 : i32, i32
  }
  func.func @transform_14(%arg0: i32) -> (i32, i32) {
    %c0_i32 = arith.constant 0 : i32
    %c0_i32_0 = arith.constant 0 : i32
    %c0_i32_1 = arith.constant 0 : i32
    return %c0_i32, %c0_i32_0 : i32, i32
  }
  func.func @transform_15(%arg0: i32) -> (i32, i32, i32) {
    %c0_i32 = arith.constant 0 : i32
    %c0_i32_0 = arith.constant 0 : i32
    %c0_i32_1 = arith.constant 0 : i32
    return %arg0, %c0_i32, %c0_i32_0 : i32, i32, i32
  }
}

</mosaic_0001>

<bundles_post_ra>
// kernel: tile.48
= control target key start
LH: loop header
LB: loop body
LE: loop exit
PB: predicated region body
PF: predicated region fallthrough
CT: control target
= control target key end

     0   :  { %s28_s0 = inlined_call_operand.vmem [shape: f32[8], index: 0, kind: input, shape index: {}]   ;;  %s29_s1 = inlined_call_operand.vmem [shape: f32[16,8], index: 1, kind: output, shape index: {}]  }
   0x1   :  { %v4_v0 = vld [vmem:[%s28_s0] ss:$0 sm:$0xff] }
   0x2   :  { %5 = vst [vmem:[%s29_s1] sm:$0xff] %v4_v0  ;;  %8 = vst [vmem:[%s29_s1 + $0x8] sm:$0xff] %v4_v0 }

// kernel: tile.49
= control target key start
LH: loop header
LB: loop body
LE: loop exit
PB: predicated region body
PF: predicated region fallthrough
CT: control target
= control target key end

     0   :  { %s133_s10 = smov 120   ;;  %s134_s11 = smov 104   ;;  %vm3_vm0 = vcmask 64512   ;;  %vm9_vm1 = vcmask 1048512   ;;  %vm15_vm2 = vcmask 982912   ;;  %vm21_vm3 = vcmask 917312   ;;  %s209_s0 = inlined_call_operand.vmem [shape: f32[16,8], index: 0, kind: input, shape index: {}]   ;;  %s210_s1 = inlined_call_operand.vmem [shape: f32[1,128], index: 1, kind: output, shape index: {}]  }
   0x1   :  { %v103_v0 = vld [vmem:[%s209_s0 + $0xf] sm:$0x1]   ;;  %v105_v1 = vld [vmem:[%s209_s0 + $0xd] sm:$0x1]   ;;  %v104_v2 = vld [vmem:[%s209_s0 + $0xe] sm:$0x1]  }
   0x2   :  { %7 = vrot.lane.b32.xlu0 %v103_v0, %s133_s10  ;;  %19 = vrot.lane.b32.xlu1 %v105_v1, %s134_s11  ;;  %v106_v3 = vld [vmem:[%s209_s0 + $0xc] sm:$0x1]   ;;  %s135_s16 = smov 112   ;;  %s136_s17 = smov 96   ;;  %v107_v4 = vld [vmem:[%s209_s0 + $0xb] sm:$0x1]  }
   0x3   :  { %v108_v5 = vld [vmem:[%s209_s0 + $0xa] sm:$0x1]   ;;  %v2_v6 = vld [vmem:[%s209_s0] sm:$0x1]   ;;  %s137_s24 = smov 88   ;;  %s138_s25 = smov 80  }
   0x4   :  { %4 = vst.msk [vmem:[#allocation0] sm:$0x1] %vm3_vm0, %v2_v6   ;;  %v109_v7 = vld [vmem:[%s209_s0 + $0x9] sm:$0x1]   ;;  %v110_v8 = vld [vmem:[%s209_s0 + $0x8] sm:$0x1]  }
   0x5   :  { %s139_s30 = smov 72   ;;  %s140_s2 = smov 64   ;;  %v111_v9 = vld [vmem:[%s209_s0 + $0x7] sm:$0x1]   ;;  %v112_v10 = vld [vmem:[%s209_s0 + $0x6] sm:$0x1]  }
   0x6   :  { %13 = vrot.lane.b32.xlu0 %v104_v2, %s135_s16  ;;  %25 = vrot.lane.b32.xlu1 %v106_v3, %s136_s17  ;;  %s141_s7 = smov 56   ;;  %s142_s8 = smov 48   ;;  %v113_v11 = vld [vmem:[%s209_s0 + $0x5] sm:$0x1]   ;;  %v114_v12 = vld [vmem:[%s209_s0 + $0x4] sm:$0x1]  }
   0x7   :  { %s143_s13 = smov 40   ;;  %s144_s14 = smov 32   ;;  %v115_v13 = vld [vmem:[%s209_s0 + $0x3] sm:$0x1]   ;;  %v116_v14 = vld [vmem:[%s209_s0 + $0x2] sm:$0x1]  }
   0x8   :  { %s145_s19 = smov 24   ;;  %s146_s20 = smov 16   ;;  %v117_v15 = vld [vmem:[%s209_s0 + $0x1] sm:$0x1]   ;;  %vm27_vm4 = vcmask 851712   ;;  %vm33_vm5 = vcmask 786112  }
   0x9   :  { %s147_s0 = smov 8   ;;  %vm39_vm6 = vcmask 720512   ;;  %vm45_vm7 = vcmask 654912   ;;  %vm51_vm8 = vcmask 589312   ;;  %vm57_vm9 = vcmask 523712  }
   0xa   :  { %31 = vrot.lane.b32.xlu0 %v107_v4, %s137_s24  ;;  %37 = vrot.lane.b32.xlu1 %v108_v5, %s138_s25  ;;  %vm63_vm10 = vcmask 458112   ;;  %vm69_vm11 = vcmask 392512   ;;  %vm75_vm12 = vcmask 326912   ;;  %vm81_vm13 = vcmask 261312  }
   0xb   :  { %vm87_vm14 = vcmask 195712   ;;  %vm93_vm15 = vcmask 130112  }
   0xe   :  { %43 = vrot.lane.b32.xlu0 %v109_v7, %s139_s30  ;;  %49 = vrot.lane.b32.xlu1 %v110_v8, %s140_s2 }
  0x12   :  { %55 = vrot.lane.b32.xlu0 %v111_v9, %s141_s7  ;;  %61 = vrot.lane.b32.xlu1 %v112_v10, %s142_s8 }
  0x16   :  { %67 = vrot.lane.b32.xlu0 %v113_v11, %s143_s13  ;;  %73 = vrot.lane.b32.xlu1 %v114_v12, %s144_s14 }
  0x1a   :  { %79 = vrot.lane.b32.xlu0 %v115_v13, %s145_s19  ;;  %85 = vrot.lane.b32.xlu1 %v116_v14, %s146_s20 }
  0x1e   :  { %91 = vrot.lane.b32.xlu0 %v117_v15, %s147_s0 }
  0x74   :  { %v8_v16 = vpop.permute.xlu0 %7   ;;  %v20_v17 = vpop.permute.xlu1 %19  }
  0x75   :  { %10 = vst.msk [vmem:[#allocation0] sm:$0x1] %vm9_vm1, %v8_v16  }
  0x78   :  { %v14_v18 = vpop.permute.xlu0 %13   ;;  %v26_v19 = vpop.permute.xlu1 %25  }
  0x79   :  { %16 = vst.msk [vmem:[#allocation0] sm:$0x1] %vm15_vm2, %v14_v18  }
  0x7a   :  { %22 = vst.msk [vmem:[#allocation0] sm:$0x1] %vm21_vm3, %v20_v17  }
  0x7b   :  { %28 = vst.msk [vmem:[#allocation0] sm:$0x1] %vm27_vm4, %v26_v19  }
  0x7c   :  { %v32_v20 = vpop.permute.xlu0 %31   ;;  %v38_v21 = vpop.permute.xlu1 %37  }
  0x7d   :  { %34 = vst.msk [vmem:[#allocation0] sm:$0x1] %vm33_vm5, %v32_v20  }
  0x7e   :  { %40 = vst.msk [vmem:[#allocation0] sm:$0x1] %vm39_vm6, %v38_v21  }
  0x80   :  { %v44_v22 = vpop.permute.xlu0 %43   ;;  %v50_v23 = vpop.permute.xlu1 %49  }
  0x81   :  { %46 = vst.msk [vmem:[#allocation0] sm:$0x1] %vm45_vm7, %v44_v22  }
  0x82   :  { %52 = vst.msk [vmem:[#allocation0] sm:$0x1] %vm51_vm8, %v50_v23  }
  0x84   :  { %v56_v24 = vpop.permute.xlu0 %55   ;;  %v62_v25 = vpop.permute.xlu1 %61  }
  0x85   :  { %58 = vst.msk [vmem:[#allocation0] sm:$0x1] %vm57_vm9, %v56_v24  }
  0x86   :  { %64 = vst.msk [vmem:[#allocation0] sm:$0x1] %vm63_vm10, %v62_v25  }
  0x88   :  { %v68_v26 = vpop.permute.xlu0 %67   ;;  %v74_v27 = vpop.permute.xlu1 %73  }
  0x89   :  { %70 = vst.msk [vmem:[#allocation0] sm:$0x1] %vm69_vm11, %v68_v26  }
  0x8a   :  { %76 = vst.msk [vmem:[#allocation0] sm:$0x1] %vm75_vm12, %v74_v27  }
  0x8c   :  { %v80_v28 = vpop.permute.xlu0 %79   ;;  %v86_v29 = vpop.permute.xlu1 %85  }
  0x8d   :  { %82 = vst.msk [vmem:[#allocation0] sm:$0x1] %vm81_vm13, %v80_v28  }
  0x8e   :  { %88 = vst.msk [vmem:[#allocation0] sm:$0x1] %vm87_vm14, %v86_v29  }
  0x90   :  { %v92_v30 = vpop.permute.xlu0 %91  }
  0x91   :  { %94 = vst.msk [vmem:[#allocation0] sm:$0x1] %vm93_vm15, %v92_v30  }
  0x98   :  { %v99_v31 = vld [vmem:[#allocation0] sm:$0x1] }
  0x99   :  { %102 = vst [vmem:[%s210_s1] sm:$0x1] %v99_v31 }

// kernel: res_double_conv_fwd.1
= control target key start
LH: loop header
LB: loop body
LE: loop exit
PB: predicated region body
PF: predicated region fallthrough
CT: control target
= control target key end

     0   :  { %s2751_s18 = smov 0   ;;  %s3395_s0 = inlined_call_operand.vmem [shape: f32[2,16,64], index: 0, kind: input, shape index: {}]   ;;  %s3396_s1 = inlined_call_operand.vmem [shape: f32[3,64,128], index: 1, kind: input, shape index: {}]   ;;  %s3397_s2 = inlined_call_operand.vmem [shape: f32[1,128], index: 2, kind: input, shape index: {}]   ;;  %s3398_s3 = inlined_call_operand.vmem [shape: f32[1,128], index: 3, kind: input, shape index: {}]   ;;  %s3399_s4 = inlined_call_operand.vmem [shape: f32[3,128,128], index: 4, kind: input, shape index: {}]   ;;  %s3400_s5 = inlined_call_operand.vmem [shape: f32[1,128], index: 5, kind: input, shape index: {}]   ;;  %s3401_s6 = inlined_call_operand.vmem [shape: f32[1,128], index: 6, kind: input, shape index: {}]   ;;  %s3402_s7 = inlined_call_operand.vmem [shape: f32[64,128], index: 7, kind: input, shape index: {}]   ;;  %s3403_s8 = inlined_call_operand.vmem [shape: f32[1,128], index: 8, kind: input, shape index: {}]   ;;  %s3404_s9 = inlined_call_operand.vmem [shape: f32[3,128,128], index: 9, kind: input, shape index: {}]   ;;  %s3405_s10 = inlined_call_operand.vmem [shape: f32[1,128], index: 10, kind: input, shape index: {}]   ;;  %s3406_s11 = inlined_call_operand.vmem [shape: f32[1,128], index: 11, kind: input, shape index: {}]   ;;  %s3407_s12 = inlined_call_operand.vmem [shape: f32[3,128,128], index: 12, kind: input, shape index: {}]   ;;  %s3408_s13 = inlined_call_operand.vmem [shape: f32[1,128], index: 13, kind: input, shape index: {}]   ;;  %s3409_s14 = inlined_call_operand.vmem [shape: f32[1,128], index: 14, kind: input, shape index: {}]   ;;  %s3410_s15 = inlined_call_operand.vmem [shape: f32[2,16,128], index: 15, kind: output, shape index: {}]  }
   0x1 LB: > { %s1911_s19 = sadd.s32 4294967295, %s2669_s18   ;;  %p1915_p0 = scmp.ge.s32.totalorder %s2669_s18, 1  ;;  %s2669_s18 = sphi %s2751_s18, %s25_s18  }
   0x2   : > { %p437_p1 = scmp.lt.s32.totalorder %s2669_s18, 3 }
   0x4   : > { %p438_p2 = pnand %p1915_p0, %p437_p1 }
   0x5   : > { %p485_p3 = scmp.lt.s32.totalorder (!%p438_p2), %s1911_s19, 1 }
   0x6   : > { %441 = sbr.rel (%p438_p2) target bundleno = 972 (0x3cc), region = 80 }
   0xb   : > { %v1927_v0 = vld [vmem:[%s3396_s1 + $0x78] sm:$0xff]  ;;  %v1926_v2 = vld [vmem:[%s3396_s1 + $0x70] sm:$0xff]  ;;  %v1925_v4 = vld [vmem:[%s3396_s1 + $0x68] sm:$0xff]  ;;  %s3414_s19 = smov (!%p485_p3, %s1911_s19), 1  ;;  %vm499_vm0 = vcmask 1040384   ;;  %vm528_vm1 = vcmask 523264  }
   0xc   : > { %v518_v1 = vld [vmem:[%s3396_s1 + $0x38] sm:$0xff]  ;;  %2264 = vmatprep.subr.mxu0 %v1927_v0  ;;  %v517_v3 = vld [vmem:[%s3396_s1 + $0x30] sm:$0xff]  ;;  %v516_v5 = vld [vmem:[%s3396_s1 + $0x28] sm:$0xff]  ;;  %s2060_s23 = sshll.u32 %s3414_s19, 4  ;;  %vm505_vm2 = vcmask 1046528  }
   0xd   : > { %2283 = vmatprep.subr.mxu1 %v518_v1  ;;  %2265 = vmatpush3.msra.mxu0 %v1927_v0  ;;  %v1924_v6 = vld [vmem:[%s3396_s1 + $0x60] sm:$0xff]  ;;  %s489_s26 = scalar_lea.vmem %s3395_s0, %s2060_s23  ;;  %v1923_v8 = vld [vmem:[%s3396_s1 + $0x58] sm:$0xff]  ;;  %v1922_v11 = vld [vmem:[%s3396_s1 + $0x50] sm:$0xff]  ;;  %s494_s22 = scalar_lea.vmem %s3410_s15, %s2060_s23 }
   0xe   : > { %2284 = vmatpush3.msra.mxu1 %v518_v1  ;;  %2266 = vmatprep.subr.mxu0 %v1926_v2  ;;  %v515_v7 = vld [vmem:[%s3396_s1 + $0x20] sm:$0xff]  ;;  %v514_v9 = vld [vmem:[%s3396_s1 + $0x18] sm:$0xff]  ;;  %v513_v12 = vld [vmem:[%s3396_s1 + $0x10] sm:$0xff] }
   0xf   : > { %2285 = vmatprep.subr.mxu1 %v517_v3  ;;  %2267 = vmatpush3.msra.mxu0 %v1926_v2  ;;  %v2797_v10 = vld [vmem:[%s489_s26] sm:$0xff]  ;;  %v2805_v13 = vld [vmem:[%s489_s26 + $0x8] sm:$0xff]  ;;  %v1939_v24 = vld [vmem:[%s3396_s1 + $0xb8] sm:$0xff] }
  0x10   : > { %2286 = vmatpush3.msra.mxu1 %v517_v3  ;;  %2268 = vmatprep.subr.mxu0 %v1925_v4  ;;  %v1921_v14 = vld [vmem:[%s3396_s1 + $0x48] sm:$0xff]  ;;  %v500_v16 = vrot.slane %v2797_v10, 7  ;;  %v501_v17 = vrot.slane %v2805_v13, 7  ;;  %v1920_v18 = vld [vmem:[%s3396_s1 + $0x40] sm:$0xff]  ;;  %v506_v20 = vrot.slane %v2797_v10, 1  ;;  %v507_v21 = vrot.slane %v2805_v13, 1  ;;  %vm2970_vm5 = vmneg %vm499_vm0 }
  0x11   : > { %2287 = vmatprep.subr.mxu1 %v516_v5  ;;  %2269 = vmatpush3.msra.mxu0 %v1925_v4  ;;  %v512_v15 = vld [vmem:[%s3396_s1 + $0x8] sm:$0xff]  ;;  %v511_v19 = vld [vmem:[%s3396_s1] sm:$0xff]  ;;  %v1959_v26 = vld [vmem:[%s3399_s4 + $0xf8] sm:$0xff] }
  0x12   : > { %2288 = vmatpush3.msra.mxu1 %v516_v5  ;;  %2270 = vmatprep.subr.mxu0 %v1924_v6  ;;  %v504_v22 = vsel %vm499_vm0, 0.0, %v500_v16  ;;  %v502_v23 = vsel %vm499_vm0, %v500_v16, %v501_v17  ;;  %v508_v25 = vsel %vm505_vm2, %v506_v20, %v507_v21  ;;  %v1938_v27 = vld [vmem:[%s3396_s1 + $0xb0] sm:$0xff]  ;;  %v1937_v29 = vld [vmem:[%s3396_s1 + $0xa8] sm:$0xff]  ;;  %v1936_v30 = vld [vmem:[%s3396_s1 + $0xa0] sm:$0xff]  ;;  %v510_v35 = vsel %vm505_vm2, %v507_v21, 0.0 }
  0x13   : > { %2289 = vmatprep.subr.mxu1 %v515_v7  ;;  %2271 = vmatpush3.msra.mxu0 %v1924_v6  ;;  %v1958_v28 = vld [vmem:[%s3399_s4 + $0xf0] sm:$0xff]  ;;  %v1935_v31 = vld [vmem:[%s3396_s1 + $0x98] sm:$0xff]  ;;  %v1933_v33 = vld [vmem:[%s3396_s1 + $0x88] sm:$0xff] }
  0x14   : > { %2290 = vmatpush3.msra.mxu1 %v515_v7  ;;  %2272 = vmatprep.subr.mxu0 %v1923_v8  ;;  %v1934_v32 = vld [vmem:[%s3396_s1 + $0x90] sm:$0xff]  ;;  %v1932_v34 = vld [vmem:[%s3396_s1 + $0x80] sm:$0xff]  ;;  %v832_v36 = vld [vmem:[%s3399_s4 + $0x78] sm:$0xff] }
  0x15   : > { %2291 = vmatprep.subr.mxu1 %v514_v9  ;;  %2273 = vmatpush3.msra.mxu0 %v1923_v8  ;;  %v1957_v37 = vld [vmem:[%s3399_s4 + $0xe8] sm:$0xff]  ;;  %v831_v38 = vld [vmem:[%s3399_s4 + $0x70] sm:$0xff]  ;;  %v1956_v39 = vld [vmem:[%s3399_s4 + $0xe0] sm:$0xff] }
  0x16   : > { %2292 = vmatpush3.msra.mxu1 %v514_v9  ;;  %2274 = vmatprep.subr.mxu0 %v1922_v11  ;;  %v830_v40 = vld [vmem:[%s3399_s4 + $0x68] sm:$0xff]  ;;  %v1955_v41 = vld [vmem:[%s3399_s4 + $0xd8] sm:$0xff]  ;;  %v829_v42 = vld [vmem:[%s3399_s4 + $0x60] sm:$0xff] }
  0x17   : > { %2293 = vmatprep.subr.mxu1 %v513_v12  ;;  %2275 = vmatpush3.msra.mxu0 %v1922_v11  ;;  %v1954_v43 = vld [vmem:[%s3399_s4 + $0xd0] sm:$0xff]  ;;  %v828_v44 = vld [vmem:[%s3399_s4 + $0x58] sm:$0xff]  ;;  %v1953_v45 = vld [vmem:[%s3399_s4 + $0xc8] sm:$0xff] }
  0x18   : > { %2294 = vmatpush3.msra.mxu1 %v513_v12  ;;  %2276 = vmatprep.subr.mxu0 %v1921_v14  ;;  %v827_v46 = vld [vmem:[%s3399_s4 + $0x50] sm:$0xff]  ;;  %v1952_v47 = vld [vmem:[%s3399_s4 + $0xc0] sm:$0xff]  ;;  %v826_v48 = vld [vmem:[%s3399_s4 + $0x48] sm:$0xff] }
  0x19   : > { %2295 = vmatprep.subr.mxu1 %v512_v15  ;;  %2277 = vmatpush3.msra.mxu0 %v1921_v14  ;;  %v1951_v49 = vld [vmem:[%s3399_s4 + $0xb8] sm:$0xff]  ;;  %v825_v50 = vld [vmem:[%s3399_s4 + $0x40] sm:$0xff]  ;;  %v1950_v51 = vld [vmem:[%s3399_s4 + $0xb0] sm:$0xff] }
  0x1a   : > { %2296 = vmatpush3.msra.mxu1 %v512_v15  ;;  %2278 = vmatprep.subr.mxu0 %v1920_v18  ;;  %v824_v52 = vld [vmem:[%s3399_s4 + $0x38] sm:$0xff]  ;;  %v1949_v53 = vld [vmem:[%s3399_s4 + $0xa8] sm:$0xff]  ;;  %v823_v54 = vld [vmem:[%s3399_s4 + $0x30] sm:$0xff] }
  0x1b   : > { %2297 = vmatprep.subr.mxu1 %v511_v19  ;;  %2279 = vmatpush3.msra.mxu0 %v1920_v18  ;;  %v1948_v55 = vld [vmem:[%s3399_s4 + $0xa0] sm:$0xff]  ;;  %v822_v56 = vld [vmem:[%s3399_s4 + $0x28] sm:$0xff]  ;;  %v1947_v57 = vld [vmem:[%s3399_s4 + $0x98] sm:$0xff] }
  0x1c   : > { %2280 = vmatprep.mubr.msk.f32.mxu0 %vm528_vm1, %v2797_v10  ;;  %2298 = vmatpush3.msra.mxu1 %v511_v19  ;;  %v821_v58 = vld [vmem:[%s3399_s4 + $0x20] sm:$0xff]  ;;  %v1946_v59 = vld [vmem:[%s3399_s4 + $0x90] sm:$0xff]  ;;  %v820_v60 = vld [vmem:[%s3399_s4 + $0x18] sm:$0xff] }
  0x1d   : > { %2299 = vmatprep.mubr.msk.f32.mxu1 %vm528_vm1, %v504_v22  ;;  %2281 = vmatmul.mubr.msk.f32.vlgmr.msra.gmra.mxu0 %vm528_vm1, %v2805_v13  ;;  %v1945_v61 = vld [vmem:[%s3399_s4 + $0x88] sm:$0xff]  ;;  %v819_v62 = vld [vmem:[%s3399_s4 + $0x10] sm:$0xff]  ;;  %v1944_v63 = vld [vmem:[%s3399_s4 + $0x80] sm:$0xff] }
  0x1e   : > { %2300 = vmatmul.mubr.msk.f32.vlgmr.msra.gmra.mxu1 %vm528_vm1, %v502_v23  ;;  %2302 = vmatprep.subr.mxu0 %v1939_v24  ;;  %v818_v0 = vld [vmem:[%s3399_s4 + $0x8] sm:$0xff]  ;;  %v1977_v1 = vld [vmem:[%s3399_s4 + $0x178] sm:$0xff]  ;;  %v817_v2 = vld [vmem:[%s3399_s4] sm:$0xff] }
  0x1f   : > { %2318 = vmatprep.mubr.msk.f32.mxu0 %vm528_vm1, %v508_v25  ;;  %2303 = vmatpush3.msra.mxu0 %v1939_v24  ;;  %v1125_v3 = vld [vmem:[%s3402_s7 + $0x38] sm:$0xff]  ;;  %v1942_v11 = vld [vmem:[%s3397_s2] ss:$0 sm:$0xff] }
  0x20   : > { %2321 = vmatprep.subr.mxu1 %v1959_v26  ;;  %2304 = vmatprep.subr.mxu0 %v1938_v27  ;;  %v1943_v15 = vld [vmem:[%s3398_s3] ss:$0 sm:$0xff] }
  0x21   : > { %2322 = vmatpush3.msra.mxu1 %v1959_v26  ;;  %2305 = vmatpush3.msra.mxu0 %v1938_v27  ;;  %v2050_v26 = vld [vmem:[%s3407_s12 + $0x158] sm:$0xff] }
  0x22   : > { %2323 = vmatprep.subr.mxu1 %v1958_v28  ;;  %2306 = vmatprep.subr.mxu0 %v1937_v29 }
  0x23   : > { %2324 = vmatpush3.msra.mxu1 %v1958_v28  ;;  %2307 = vmatpush3.msra.mxu0 %v1937_v29 }
  0x24   : > { %2308 = vmatprep.subr.mxu0 %v1936_v30  ;;  %2325 = vmatprep.subr.mxu1 %v1957_v37 }
  0x25   : > { %2309 = vmatpush3.msra.mxu0 %v1936_v30  ;;  %2326 = vmatpush3.msra.mxu1 %v1957_v37  ;;  %v1123_v37 = vld [vmem:[%s3402_s7 + $0x28] sm:$0xff] }
  0x26   : > { %2310 = vmatprep.subr.mxu0 %v1935_v31  ;;  %2327 = vmatprep.subr.mxu1 %v1956_v39 }
  0x27   : > { %2311 = vmatpush3.msra.mxu0 %v1935_v31  ;;  %2328 = vmatpush3.msra.mxu1 %v1956_v39  ;;  %v1976_v31 = vld [vmem:[%s3399_s4 + $0x170] sm:$0xff]  ;;  %v1122_v39 = vld [vmem:[%s3402_s7 + $0x20] sm:$0xff] }
  0x28   : > { %2312 = vmatprep.subr.mxu0 %v1934_v32  ;;  %2329 = vmatprep.subr.mxu1 %v1955_v41 }
  0x29   : > { %2313 = vmatpush3.msra.mxu0 %v1934_v32  ;;  %2330 = vmatpush3.msra.mxu1 %v1955_v41  ;;  %v1121_v41 = vld [vmem:[%s3402_s7 + $0x18] sm:$0xff] }
  0x2a   : > { %2314 = vmatprep.subr.mxu0 %v1933_v33  ;;  %2331 = vmatprep.subr.mxu1 %v1954_v43 }
  0x2b   : > { %2315 = vmatpush3.msra.mxu0 %v1933_v33  ;;  %2332 = vmatpush3.msra.mxu1 %v1954_v43  ;;  %v1120_v43 = vld [vmem:[%s3402_s7 + $0x10] sm:$0xff] }
  0x2c   : > { %2316 = vmatprep.subr.mxu0 %v1932_v34  ;;  %2333 = vmatprep.subr.mxu1 %v1953_v45 }
  0x2d   : > { %2317 = vmatpush3.msra.mxu0 %v1932_v34  ;;  %2334 = vmatpush3.msra.mxu1 %v1953_v45  ;;  %v1975_v34 = vld [vmem:[%s3399_s4 + $0x168] sm:$0xff] }
  0x2e   : > { %2319 = vmatmul.mubr.msk.f32.vlgmr.msra.gmra.mxu0 %vm528_vm1, %v510_v35  ;;  %2356 = vmatprep.subr.mxu0 %v832_v36  ;;  %v1124_v35 = vld [vmem:[%s3402_s7 + $0x30] sm:$0xff]  ;;  %v1119_v45 = vld [vmem:[%s3402_s7 + $0x8] sm:$0xff] }
  0x2f   : > { %2357 = vmatpush3.msra.mxu0 %v832_v36  ;;  %2335 = vmatprep.subr.mxu1 %v1952_v47  ;;  %v1974_v36 = vld [vmem:[%s3399_s4 + $0x160] sm:$0xff] }
  0x30   : > { %2358 = vmatprep.subr.mxu0 %v831_v38  ;;  %2336 = vmatpush3.msra.mxu1 %v1952_v47  ;;  %v1118_v47 = vld [vmem:[%s3402_s7] sm:$0xff] }
  0x31   : > { %2359 = vmatpush3.msra.mxu0 %v831_v38  ;;  %2337 = vmatprep.subr.mxu1 %v1951_v49  ;;  %v1973_v38 = vld [vmem:[%s3399_s4 + $0x158] sm:$0xff] }
  0x32   : > { %2360 = vmatprep.subr.mxu0 %v830_v40  ;;  %2338 = vmatpush3.msra.mxu1 %v1951_v49  ;;  %v1967_v49 = vld [vmem:[%s3399_s4 + $0x128] sm:$0xff] }
  0x33   : > { %2361 = vmatpush3.msra.mxu0 %v830_v40  ;;  %2339 = vmatprep.subr.mxu1 %v1950_v51  ;;  %v1972_v40 = vld [vmem:[%s3399_s4 + $0x150] sm:$0xff] }
  0x34   : > { %2362 = vmatprep.subr.mxu0 %v829_v42  ;;  %2340 = vmatpush3.msra.mxu1 %v1950_v51  ;;  %v1965_v51 = vld [vmem:[%s3399_s4 + $0x118] sm:$0xff] }
  0x35   : > { %2363 = vmatpush3.msra.mxu0 %v829_v42  ;;  %2341 = vmatprep.subr.mxu1 %v1949_v53  ;;  %v1971_v42 = vld [vmem:[%s3399_s4 + $0x148] sm:$0xff] }
  0x36   : > { %2364 = vmatprep.subr.mxu0 %v828_v44  ;;  %2342 = vmatpush3.msra.mxu1 %v1949_v53  ;;  %v1999_v53 = vld [vmem:[%s3404_s9 + $0xf8] sm:$0xff] }
  0x37   : > { %2365 = vmatpush3.msra.mxu0 %v828_v44  ;;  %2343 = vmatprep.subr.mxu1 %v1948_v55  ;;  %v1970_v44 = vld [vmem:[%s3399_s4 + $0x140] sm:$0xff] }
  0x38   : > { %2366 = vmatprep.subr.mxu0 %v827_v46  ;;  %2344 = vmatpush3.msra.mxu1 %v1948_v55  ;;  %v1245_v55 = vld [vmem:[%s3404_s9 + $0x78] sm:$0xff] }
  0x39   : > { %2367 = vmatpush3.msra.mxu0 %v827_v46  ;;  %2345 = vmatprep.subr.mxu1 %v1947_v57  ;;  %v1969_v46 = vld [vmem:[%s3399_s4 + $0x138] sm:$0xff] }
  0x3a   : > { %2368 = vmatprep.subr.mxu0 %v826_v48  ;;  %2346 = vmatpush3.msra.mxu1 %v1947_v57  ;;  %v1997_v57 = vld [vmem:[%s3404_s9 + $0xe8] sm:$0xff] }
  0x3b   : > { %2369 = vmatpush3.msra.mxu0 %v826_v48  ;;  %2347 = vmatprep.subr.mxu1 %v1946_v59  ;;  %v1968_v48 = vld [vmem:[%s3399_s4 + $0x130] sm:$0xff] }
  0x3c   : > { %2370 = vmatprep.subr.mxu0 %v825_v50  ;;  %2348 = vmatpush3.msra.mxu1 %v1946_v59  ;;  %v1996_v59 = vld [vmem:[%s3404_s9 + $0xe0] sm:$0xff] }
  0x3d   : > { %2371 = vmatpush3.msra.mxu0 %v825_v50  ;;  %2349 = vmatprep.subr.mxu1 %v1945_v61  ;;  %v1966_v50 = vld [vmem:[%s3399_s4 + $0x120] sm:$0xff] }
  0x3e   : > { %2372 = vmatprep.subr.mxu0 %v824_v52  ;;  %2350 = vmatpush3.msra.mxu1 %v1945_v61  ;;  %v1995_v61 = vld [vmem:[%s3404_s9 + $0xd8] sm:$0xff] }
  0x3f   : > { %2373 = vmatpush3.msra.mxu0 %v824_v52  ;;  %2351 = vmatprep.subr.mxu1 %v1944_v63  ;;  %v1964_v52 = vld [vmem:[%s3399_s4 + $0x110] sm:$0xff] }
  0x40   : > { %2374 = vmatprep.subr.mxu0 %v823_v54  ;;  %2352 = vmatpush3.msra.mxu1 %v1944_v63  ;;  %v1994_v63 = vld [vmem:[%s3404_s9 + $0xd0] sm:$0xff] }
  0x41   : > { %2375 = vmatpush3.msra.mxu0 %v823_v54  ;;  %2391 = vmatprep.subr.mxu1 %v1977_v1  ;;  %v1998_v54 = vld [vmem:[%s3404_s9 + $0xf0] sm:$0xff] }
  0x42   : > { %2376 = vmatprep.subr.mxu0 %v822_v56 }
  0x43   : > { %2377 = vmatpush3.msra.mxu0 %v822_v56  ;;  %v1244_v56 = vld [vmem:[%s3404_s9 + $0x70] sm:$0xff] }
  0x44   : > { %2378 = vmatprep.subr.mxu0 %v821_v58 }
  0x45   : > { %2379 = vmatpush3.msra.mxu0 %v821_v58  ;;  %v1243_v58 = vld [vmem:[%s3404_s9 + $0x68] sm:$0xff] }
  0x46   : > { %2380 = vmatprep.subr.mxu0 %v820_v60 }
  0x47   : > { %2381 = vmatpush3.msra.mxu0 %v820_v60  ;;  %v1242_v60 = vld [vmem:[%s3404_s9 + $0x60] sm:$0xff] }
  0x48   : > { %2382 = vmatprep.subr.mxu0 %v819_v62 }
  0x49   : > { %2383 = vmatpush3.msra.mxu0 %v819_v62  ;;  %v1241_v62 = vld [vmem:[%s3404_s9 + $0x58] sm:$0xff] }
  0x4a   : > { %2384 = vmatprep.subr.mxu0 %v818_v0 }
  0x4b   : > { %2385 = vmatpush3.msra.mxu0 %v818_v0  ;;  %v1240_v0 = vld [vmem:[%s3404_s9 + $0x50] sm:$0xff] }
  0x4c   : > { %2386 = vmatprep.subr.mxu0 %v817_v2 }
  0x4d   : > { %2387 = vmatpush3.msra.mxu0 %v817_v2  ;;  %v1992_v2 = vld [vmem:[%s3404_s9 + $0xc0] sm:$0xff] }
  0x4e   : > { %2426 = vmatprep.subr.mxu0 %v1125_v3 }
  0xdd   : > { %v2282_v4 = vpop.f32.mrf.mxu0 }
  0xde   : > { %v2301_v5 = vpop.f32.mrf.mxu1 }
  0xdf   : > { %v599_v6 = vpop.f32.mrf.mxu0  ;;  %v685_v8 = vadd.f32 %v2301_v5, %v2282_v4  ;;  %v1991_v4 = vld [vmem:[%s3404_s9 + $0xb8] sm:$0xff]  ;;  %v1238_v5 = vld [vmem:[%s3404_s9 + $0x40] sm:$0xff] }
  0xe0   : > { %v679_v7 = vpop.f32.mrf.mxu1 }
  0xe1   : > { %v680_v12 = vadd.f32 %v679_v7, %v599_v6  ;;  %v1990_v6 = vld [vmem:[%s3404_s9 + $0xb0] sm:$0xff]  ;;  %v1237_v7 = vld [vmem:[%s3404_s9 + $0x38] sm:$0xff] }
  0xee   : > { %v2320_v9 = vpop.f32.mrf.mxu0 }
  0xef   : > { %v778_v14 = vadd.f32 %v2320_v9, %v685_v8  ;;  %v1989_v8 = vld [vmem:[%s3404_s9 + $0xa8] sm:$0xff]  ;;  %v1236_v9 = vld [vmem:[%s3404_s9 + $0x30] sm:$0xff] }
  0xf0   : > { %v768_v16 = vpop.f32.mrf.mxu0 }
  0xf1   : > { %v787_v17 = vmul.f32 %v1942_v11, %v778_v14  ;;  %v777_v18 = vadd.f32 %v768_v16, %v680_v12  ;;  %v1235_v12 = vld [vmem:[%s3404_s9 + $0x28] sm:$0xff]  ;;  %v1987_v14 = vld [vmem:[%s3404_s9 + $0x98] sm:$0xff]  ;;  %v1986_v16 = vld [vmem:[%s3404_s9 + $0x90] sm:$0xff] }
  0xf3   : > { %v796_v19 = vadd.f32 %v1943_v15, %v787_v17  ;;  %v786_v20 = vmul.f32 %v1942_v11, %v777_v18  ;;  %v1988_v11 = vld [vmem:[%s3404_s9 + $0xa0] sm:$0xff]  ;;  %v1233_v17 = vld [vmem:[%s3404_s9 + $0x18] sm:$0xff]  ;;  %v1985_v18 = vld [vmem:[%s3404_s9 + $0x88] sm:$0xff] }
  0xf5   : > { %v795_v21 = vadd.f32 %v1943_v15, %v786_v20  ;;  %vm798_vm3 = vcmp.gt.f32.partialorder %v796_v19, 0.0  ;;  %v800_v22 = vmul.f32 0.01, %v796_v19  ;;  %v1234_v15 = vld [vmem:[%s3404_s9 + $0x20] sm:$0xff] }
  0xf6   : > { %v1984_v20 = vld [vmem:[%s3404_s9 + $0x80] sm:$0xff] }
  0xf7   : > { %vm797_vm4 = vcmp.gt.f32.partialorder %v795_v21, 0.0  ;;  %v799_v23 = vmul.f32 0.01, %v795_v21  ;;  %v2967_v24 = vsel %vm798_vm3, %v796_v19, %v800_v22  ;;  %v1232_v19 = vld [vmem:[%s3404_s9 + $0x10] sm:$0xff]  ;;  %v2017_v22 = vld [vmem:[%s3404_s9 + $0x178] sm:$0xff] }
  0xf8   : > { %v806_v29 = vrot.slane %v2967_v24, 7  ;;  %v812_v30 = vrot.slane %v2967_v24, 1 }
  0xf9   : > { %v801_v25 = vsel %vm797_vm4, %v795_v21, %v799_v23  ;;  %v1231_v21 = vld [vmem:[%s3404_s9 + $0x8] sm:$0xff]  ;;  %v1230_v23 = vld [vmem:[%s3404_s9] sm:$0xff] }
  0xfa   : > { %v805_v27 = vrot.slane %v801_v25, 7  ;;  %v811_v28 = vrot.slane %v801_v25, 1  ;;  %2353 = vmatprep.mubr.f32.mxu1 %v801_v25 }
  0xfb   : > { %2354 = vmatmul.mubr.f32.vlgmr.msra.gmra.mxu1 %v2967_v24 }
  0xfc   : > { %2392 = vmatpush3.msra.mxu1 %v1977_v1  ;;  %2388 = vmatprep.mubr.msk.f32.mxu0 %vm2970_vm5, %v805_v27  ;;  %v807_v32 = vsel %vm499_vm0, %v805_v27, %v806_v29  ;;  %v813_v33 = vsel %vm505_vm2, %v811_v28, %v812_v30  ;;  %v1993_v1 = vld [vmem:[%s3404_s9 + $0xc8] sm:$0xff] }
  0xfd   : > { %2393 = vmatprep.subr.mxu1 %v1976_v31  ;;  %2389 = vmatmul.mubr.f32.vlgmr.msra.gmra.mxu0 %v807_v32 }
  0xfe   : > { %2394 = vmatpush3.msra.mxu1 %v1976_v31  ;;  %2423 = vmatprep.mubr.f32.mxu1 %v813_v33  ;;  %v1979_v31 = vld [vmem:[%s3400_s5] ss:$0 sm:$0xff] }
  0xff   : > { %2395 = vmatprep.subr.mxu1 %v1975_v34  ;;  %2427 = vmatpush3.msra.mxu0 %v1125_v3  ;;  %v1239_v3 = vld [vmem:[%s3404_s9 + $0x48] sm:$0xff] }
 0x100   : > { %2396 = vmatpush3.msra.mxu1 %v1975_v34  ;;  %2428 = vmatprep.subr.mxu0 %v1124_v35  ;;  %v1980_v34 = vld [vmem:[%s3401_s6] ss:$0 sm:$0xff] }
 0x101   : > { %2397 = vmatprep.subr.mxu1 %v1974_v36  ;;  %2429 = vmatpush3.msra.mxu0 %v1124_v35 }
 0x102   : > { %2398 = vmatpush3.msra.mxu1 %v1974_v36  ;;  %2430 = vmatprep.subr.mxu0 %v1123_v37 }
 0x103   : > { %2399 = vmatprep.subr.mxu1 %v1973_v38  ;;  %2431 = vmatpush3.msra.mxu0 %v1123_v37 }
 0x104   : > { %2400 = vmatpush3.msra.mxu1 %v1973_v38  ;;  %2432 = vmatprep.subr.mxu0 %v1122_v39 }
 0x105   : > { %2401 = vmatprep.subr.mxu1 %v1972_v40  ;;  %2433 = vmatpush3.msra.mxu0 %v1122_v39  ;;  %v1981_v39 = vld [vmem:[%s3403_s8] ss:$0 sm:$0xff] }
 0x106   : > { %2402 = vmatpush3.msra.mxu1 %v1972_v40  ;;  %2434 = vmatprep.subr.mxu0 %v1121_v41 }
 0x107   : > { %2403 = vmatprep.subr.mxu1 %v1971_v42  ;;  %2435 = vmatpush3.msra.mxu0 %v1121_v41 }
 0x108   : > { %2404 = vmatpush3.msra.mxu1 %v1971_v42  ;;  %2436 = vmatprep.subr.mxu0 %v1120_v43 }
 0x109   : > { %2405 = vmatprep.subr.mxu1 %v1970_v44  ;;  %2437 = vmatpush3.msra.mxu0 %v1120_v43 }
 0x10a   : > { %2406 = vmatpush3.msra.mxu1 %v1970_v44  ;;  %2438 = vmatprep.subr.mxu0 %v1119_v45 }
 0x10b   : > { %2407 = vmatprep.subr.mxu1 %v1969_v46  ;;  %2439 = vmatpush3.msra.mxu0 %v1119_v45 }
 0x10c   : > { %2408 = vmatpush3.msra.mxu1 %v1969_v46  ;;  %2440 = vmatprep.subr.mxu0 %v1118_v47 }
 0x10d   : > { %2409 = vmatprep.subr.mxu1 %v1968_v48  ;;  %2441 = vmatpush3.msra.mxu0 %v1118_v47 }
 0x10e   : > { %2410 = vmatpush3.msra.mxu1 %v1968_v48  ;;  %2442 = vmatprep.mubr.msk.f32.mxu0 %vm528_vm1, %v2797_v10  ;;  %v1963_v10 = vld [vmem:[%s3399_s4 + $0x108] sm:$0xff] }
 0x10f   : > { %2411 = vmatprep.subr.mxu1 %v1967_v49  ;;  %2443 = vmatmul.mubr.msk.f32.vlgmr.msra.gmra.mxu0 %vm528_vm1, %v2805_v13  ;;  %v1962_v13 = vld [vmem:[%s3399_s4 + $0x100] sm:$0xff] }
 0x110   : > { %2412 = vmatpush3.msra.mxu1 %v1967_v49  ;;  %2445 = vmatprep.subr.mxu0 %v1999_v53 }
 0x111   : > { %2413 = vmatprep.subr.mxu1 %v1966_v50  ;;  %2446 = vmatpush3.msra.mxu0 %v1999_v53 }
 0x112   : > { %2414 = vmatpush3.msra.mxu1 %v1966_v50  ;;  %2447 = vmatprep.subr.mxu0 %v1998_v54 }
 0x113   : > { %2415 = vmatprep.subr.mxu1 %v1965_v51  ;;  %2448 = vmatpush3.msra.mxu0 %v1998_v54 }
 0x114   : > { %2416 = vmatpush3.msra.mxu1 %v1965_v51  ;;  %2449 = vmatprep.subr.mxu0 %v1997_v57 }
 0x115   : > { %2417 = vmatprep.subr.mxu1 %v1964_v52  ;;  %2450 = vmatpush3.msra.mxu0 %v1997_v57 }
 0x116   : > { %2418 = vmatpush3.msra.mxu1 %v1964_v52  ;;  %2451 = vmatprep.subr.mxu0 %v1996_v59 }
 0x117   : > { %2419 = vmatprep.subr.mxu1 %v1963_v10  ;;  %2452 = vmatpush3.msra.mxu0 %v1996_v59 }
 0x118   : > { %2420 = vmatpush3.msra.mxu1 %v1963_v10  ;;  %2453 = vmatprep.subr.mxu0 %v1995_v61 }
 0x119   : > { %2421 = vmatprep.subr.mxu1 %v1962_v13  ;;  %2454 = vmatpush3.msra.mxu0 %v1995_v61  ;;  %v2015_v61 = vld [vmem:[%s3404_s9 + $0x168] sm:$0xff] }
 0x11a   : > { %2422 = vmatpush3.msra.mxu1 %v1962_v13  ;;  %2455 = vmatprep.subr.mxu0 %v1994_v63 }
 0x11b   : > { %2424 = vmatmul.mubr.msk.f32.vlgmr.msra.gmra.mxu1 %vm505_vm2, %v812_v30  ;;  %2480 = vmatprep.subr.mxu1 %v1245_v55 }
 0x11c   : > { %2481 = vmatpush3.msra.mxu1 %v1245_v55  ;;  %2456 = vmatpush3.msra.mxu0 %v1994_v63  ;;  %v2013_v63 = vld [vmem:[%s3404_s9 + $0x158] sm:$0xff] }
 0x11d   : > { %2482 = vmatprep.subr.mxu1 %v1244_v56  ;;  %2457 = vmatprep.subr.mxu0 %v1993_v1 }
 0x11e   : > { %2483 = vmatpush3.msra.mxu1 %v1244_v56  ;;  %2458 = vmatpush3.msra.mxu0 %v1993_v1  ;;  %v2016_v56 = vld [vmem:[%s3404_s9 + $0x170] sm:$0xff]  ;;  %v2011_v1 = vld [vmem:[%s3404_s9 + $0x148] sm:$0xff] }
 0x11f   : > { %2484 = vmatprep.subr.mxu1 %v1243_v58  ;;  %2459 = vmatprep.subr.mxu0 %v1992_v2 }
 0x120   : > { %2485 = vmatpush3.msra.mxu1 %v1243_v58  ;;  %2460 = vmatpush3.msra.mxu0 %v1992_v2  ;;  %v2010_v2 = vld [vmem:[%s3404_s9 + $0x140] sm:$0xff] }
 0x121   : > { %2486 = vmatprep.subr.mxu1 %v1242_v60  ;;  %2461 = vmatprep.subr.mxu0 %v1991_v4 }
 0x122   : > { %2487 = vmatpush3.msra.mxu1 %v1242_v60  ;;  %2462 = vmatpush3.msra.mxu0 %v1991_v4  ;;  %v2008_v4 = vld [vmem:[%s3404_s9 + $0x130] sm:$0xff] }
 0x123   : > { %2488 = vmatprep.subr.mxu1 %v1241_v62  ;;  %2463 = vmatprep.subr.mxu0 %v1990_v6 }
 0x124   : > { %2489 = vmatpush3.msra.mxu1 %v1241_v62  ;;  %2464 = vmatpush3.msra.mxu0 %v1990_v6  ;;  %v2014_v62 = vld [vmem:[%s3404_s9 + $0x160] sm:$0xff] }
 0x125   : > { %2490 = vmatprep.subr.mxu1 %v1240_v0  ;;  %2465 = vmatprep.subr.mxu0 %v1989_v8  ;;  %v2006_v6 = vld [vmem:[%s3404_s9 + $0x120] sm:$0xff] }
 0x126   : > { %2491 = vmatpush3.msra.mxu1 %v1240_v0  ;;  %2466 = vmatpush3.msra.mxu0 %v1989_v8  ;;  %v2012_v0 = vld [vmem:[%s3404_s9 + $0x150] sm:$0xff] }
 0x127   : > { %2492 = vmatprep.subr.mxu1 %v1239_v3  ;;  %2467 = vmatprep.subr.mxu0 %v1988_v11  ;;  %v2004_v8 = vld [vmem:[%s3404_s9 + $0x110] sm:$0xff] }
 0x128   : > { %2493 = vmatpush3.msra.mxu1 %v1239_v3  ;;  %2468 = vmatpush3.msra.mxu0 %v1988_v11  ;;  %v2009_v3 = vld [vmem:[%s3404_s9 + $0x138] sm:$0xff]  ;;  %v2002_v11 = vld [vmem:[%s3404_s9 + $0x100] sm:$0xff] }
 0x129   : > { %2494 = vmatprep.subr.mxu1 %v1238_v5  ;;  %2469 = vmatprep.subr.mxu0 %v1987_v14 }
 0x12a   : > { %2495 = vmatpush3.msra.mxu1 %v1238_v5  ;;  %2470 = vmatpush3.msra.mxu0 %v1987_v14  ;;  %v2007_v5 = vld [vmem:[%s3404_s9 + $0x128] sm:$0xff]  ;;  %v2035_v14 = vld [vmem:[%s3407_s12 + $0xf0] sm:$0xff] }
 0x12b   : > { %2496 = vmatprep.subr.mxu1 %v1237_v7  ;;  %2471 = vmatprep.subr.mxu0 %v1986_v16 }
 0x12c   : > { %2497 = vmatpush3.msra.mxu1 %v1237_v7  ;;  %2472 = vmatpush3.msra.mxu0 %v1986_v16  ;;  %v2005_v7 = vld [vmem:[%s3404_s9 + $0x118] sm:$0xff]  ;;  %v1559_v16 = vld [vmem:[%s3407_s12 + $0x70] sm:$0xff] }
 0x12d   : > { %2498 = vmatprep.subr.mxu1 %v1236_v9  ;;  %2473 = vmatprep.subr.mxu0 %v1985_v18 }
 0x12e   : > { %2499 = vmatpush3.msra.mxu1 %v1236_v9  ;;  %2474 = vmatpush3.msra.mxu0 %v1985_v18  ;;  %v2003_v9 = vld [vmem:[%s3404_s9 + $0x108] sm:$0xff] }
 0x12f   : > { %2500 = vmatprep.subr.mxu1 %v1235_v12  ;;  %2475 = vmatprep.subr.mxu0 %v1984_v20  ;;  %v1558_v18 = vld [vmem:[%s3407_s12 + $0x68] sm:$0xff] }
 0x130   : > { %2501 = vmatpush3.msra.mxu1 %v1235_v12  ;;  %2476 = vmatpush3.msra.mxu0 %v1984_v20  ;;  %v2036_v12 = vld [vmem:[%s3407_s12 + $0xf8] sm:$0xff]  ;;  %v1557_v20 = vld [vmem:[%s3407_s12 + $0x60] sm:$0xff] }
 0x131   : > { %2502 = vmatprep.subr.mxu1 %v1234_v15  ;;  %2515 = vmatprep.subr.mxu0 %v2017_v22 }
 0x132   : > { %2503 = vmatpush3.msra.mxu1 %v1234_v15  ;;  %v1560_v15 = vld [vmem:[%s3407_s12 + $0x78] sm:$0xff] }
 0x133   : > { %2504 = vmatprep.subr.mxu1 %v1233_v17 }
 0x134   : > { %2505 = vmatpush3.msra.mxu1 %v1233_v17  ;;  %v2034_v17 = vld [vmem:[%s3407_s12 + $0xe8] sm:$0xff] }
 0x135   : > { %2506 = vmatprep.subr.mxu1 %v1232_v19 }
 0x136   : > { %2507 = vmatpush3.msra.mxu1 %v1232_v19  ;;  %v2033_v19 = vld [vmem:[%s3407_s12 + $0xe0] sm:$0xff] }
 0x137   : > { %2508 = vmatprep.subr.mxu1 %v1231_v21 }
 0x138   : > { %2509 = vmatpush3.msra.mxu1 %v1231_v21  ;;  %v2032_v21 = vld [vmem:[%s3407_s12 + $0xd8] sm:$0xff] }
 0x139   : > { %2510 = vmatprep.subr.mxu1 %v1230_v23 }
 0x13a   : > { %2511 = vmatpush3.msra.mxu1 %v1230_v23  ;;  %v2031_v23 = vld [vmem:[%s3407_s12 + $0xd0] sm:$0xff] }
 0x13b   : > { %2550 = vmatprep.subr.mxu1 %v2036_v12 }
 0x1bb   : > { %v2355_v24 = vpop.f32.mrf.mxu1 }
 0x1bd   : > { %v2390_v25 = vpop.f32.mrf.mxu0  ;;  %v916_v27 = vpop.f32.mrf.mxu1 }
 0x1be   : > { %v997_v29 = vadd.f32 %v2390_v25, %v2355_v24  ;;  %v1555_v24 = vld [vmem:[%s3407_s12 + $0x50] sm:$0xff]  ;;  %v2030_v25 = vld [vmem:[%s3407_s12 + $0xc8] sm:$0xff] }
 0x1bf   : > { %v991_v28 = vpop.f32.mrf.mxu0 }
 0x1c0   : > { %v992_v32 = vadd.f32 %v991_v28, %v916_v27  ;;  %v1554_v27 = vld [vmem:[%s3407_s12 + $0x48] sm:$0xff]  ;;  %v2029_v28 = vld [vmem:[%s3407_s12 + $0xc0] sm:$0xff] }
 0x1cf   : > { %v2444_v38 = vpop.f32.mrf.mxu0 }
 0x1d0   : > { %v1205_v42 = vadd.f32 %v2444_v38, %v1981_v39  ;;  %v1549_v38 = vld [vmem:[%s3407_s12 + $0x20] sm:$0xff] }
 0x1d1   : > { %v1199_v45 = vpop.f32.mrf.mxu0 }
 0x1d2   : > { %v1200_v49 = vadd.f32 %v1981_v39, %v1199_v45  ;;  %v2023_v39 = vld [vmem:[%s3407_s12 + $0x90] sm:$0xff]  ;;  %v2054_v45 = vld [vmem:[%s3407_s12 + $0x178] sm:$0xff] }
 0x1db   : > { %v2425_v30 = vpop.f32.mrf.mxu1 }
 0x1dc   : > { %v1093_v33 = vadd.f32 %v2425_v30, %v997_v29  ;;  %v1553_v29 = vld [vmem:[%s3407_s12 + $0x40] sm:$0xff]  ;;  %v2028_v30 = vld [vmem:[%s3407_s12 + $0xb8] sm:$0xff] }
 0x1dd   : > { %v1083_v35 = vpop.f32.mrf.mxu1 }
 0x1de   : > { %v1102_v36 = vmul.f32 %v1979_v31, %v1093_v33  ;;  %v1092_v37 = vadd.f32 %v1083_v35, %v992_v32  ;;  %v2027_v32 = vld [vmem:[%s3407_s12 + $0xb0] sm:$0xff]  ;;  %v2026_v33 = vld [vmem:[%s3407_s12 + $0xa8] sm:$0xff]  ;;  %v2025_v35 = vld [vmem:[%s3407_s12 + $0xa0] sm:$0xff] }
 0x1e0   : > { %v1111_v40 = vadd.f32 %v1980_v34, %v1102_v36  ;;  %v1101_v41 = vmul.f32 %v1979_v31, %v1092_v37  ;;  %v1552_v31 = vld [vmem:[%s3407_s12 + $0x38] sm:$0xff]  ;;  %v1550_v36 = vld [vmem:[%s3407_s12 + $0x28] sm:$0xff] }
 0x1e1   : > { %v2024_v37 = vld [vmem:[%s3407_s12 + $0x98] sm:$0xff] }
 0x1e2   : > { %v1110_v43 = vadd.f32 %v1980_v34, %v1101_v41  ;;  %vm1113_vm6 = vcmp.gt.f32.partialorder %v1111_v40, 0.0  ;;  %v1115_v44 = vmul.f32 0.01, %v1111_v40  ;;  %v1551_v34 = vld [vmem:[%s3407_s12 + $0x30] sm:$0xff]  ;;  %v2022_v41 = vld [vmem:[%s3407_s12 + $0x88] sm:$0xff] }
 0x1e4   : > { %v1117_v46 = vsel %vm1113_vm6, %v1111_v40, %v1115_v44  ;;  %vm1112_vm7 = vcmp.gt.f32.partialorder %v1110_v43, 0.0  ;;  %v1114_v47 = vmul.f32 0.01, %v1110_v43  ;;  %v1548_v40 = vld [vmem:[%s3407_s12 + $0x18] sm:$0xff]  ;;  %v1546_v44 = vld [vmem:[%s3407_s12 + $0x8] sm:$0xff] }
 0x1e5   : > { %v1209_v48 = vadd.f32 %v1205_v42, %v1117_v46  ;;  %v1547_v42 = vld [vmem:[%s3407_s12 + $0x10] sm:$0xff]  ;;  %v1545_v46 = vld [vmem:[%s3407_s12] sm:$0xff] }
 0x1e6   : > { %v1116_v50 = vsel %vm1112_vm7, %v1110_v43, %v1114_v47  ;;  %v2021_v43 = vld [vmem:[%s3407_s12 + $0x80] sm:$0xff] }
 0x1e7   : > { %v1213_v51 = vmul.f32 0.01, %v1209_v48  ;;  %v1208_v52 = vadd.f32 %v1200_v49, %v1116_v50  ;;  %vm1211_vm8 = vcmp.gt.f32.partialorder %v1209_v48, 0.0 }
 0x1e9   : > { %v1212_v10 = vmul.f32 0.01, %v1208_v52  ;;  %vm1210_vm9 = vcmp.gt.f32.partialorder %v1208_v52, 0.0  ;;  %v3164_v13 = vsel %vm1211_vm8, %v1209_v48, %v1213_v51 }
 0x1ea   : > { %v1219_v54 = vrot.slane %v3164_v13, 7  ;;  %v1225_v58 = vrot.slane %v3164_v13, 1 }
 0x1eb   : > { %v3166_v53 = vsel %vm1210_vm9, %v1208_v52, %v1212_v10  ;;  %v2019_v10 = vld [vmem:[%s3405_s10] ss:$0 sm:$0xff] }
 0x1ec   : > { %2477 = vmatprep.mubr.f32.mxu0 %v3166_v53  ;;  %v1218_v55 = vrot.slane %v3166_v53, 7  ;;  %v1224_v57 = vrot.slane %v3166_v53, 1 }
 0x1ed   : > { %2478 = vmatmul.mubr.f32.vlgmr.msra.gmra.mxu0 %v3164_v13 }
 0x1ee   : > { %2516 = vmatpush3.msra.mxu0 %v2017_v22  ;;  %2512 = vmatprep.mubr.msk.f32.mxu1 %vm2970_vm5, %v1218_v55  ;;  %v1220_v59 = vsel %vm499_vm0, %v1218_v55, %v1219_v54  ;;  %v1226_v60 = vsel %vm505_vm2, %v1224_v57, %v1225_v58  ;;  %v1556_v22 = vld [vmem:[%s3407_s12 + $0x58] sm:$0xff] }
 0x1ef   : > { %2517 = vmatprep.subr.mxu0 %v2016_v56  ;;  %2513 = vmatmul.mubr.f32.vlgmr.msra.gmra.mxu1 %v1220_v59 }
 0x1f0   : > { %2518 = vmatpush3.msra.mxu0 %v2016_v56  ;;  %2547 = vmatprep.mubr.f32.mxu0 %v1226_v60  ;;  %v2020_v56 = vld [vmem:[%s3406_s11] ss:$0 sm:$0xff] }
 0x1f1   : > { %2519 = vmatprep.subr.mxu0 %v2015_v61  ;;  %2551 = vmatpush3.msra.mxu1 %v2036_v12  ;;  %v2051_v12 = vld [vmem:[%s3407_s12 + $0x160] sm:$0xff] }
 0x1f2   : > { %2520 = vmatpush3.msra.mxu0 %v2015_v61  ;;  %2552 = vmatprep.subr.mxu1 %v2035_v14 }
 0x1f3   : > { %2521 = vmatprep.subr.mxu0 %v2014_v62  ;;  %2553 = vmatpush3.msra.mxu1 %v2035_v14  ;;  %v2049_v14 = vld [vmem:[%s3407_s12 + $0x150] sm:$0xff] }
 0x1f4   : > { %2522 = vmatpush3.msra.mxu0 %v2014_v62  ;;  %2554 = vmatprep.subr.mxu1 %v2034_v17 }
 0x1f5   : > { %2523 = vmatprep.subr.mxu0 %v2013_v63  ;;  %2555 = vmatpush3.msra.mxu1 %v2034_v17  ;;  %v2046_v17 = vld [vmem:[%s3407_s12 + $0x138] sm:$0xff] }
 0x1f6   : > { %2524 = vmatpush3.msra.mxu0 %v2013_v63  ;;  %2556 = vmatprep.subr.mxu1 %v2033_v19 }
 0x1f7   : > { %2525 = vmatprep.subr.mxu0 %v2012_v0  ;;  %2557 = vmatpush3.msra.mxu1 %v2033_v19  ;;  %v2044_v19 = vld [vmem:[%s3407_s12 + $0x128] sm:$0xff] }
 0x1f8   : > { %2526 = vmatpush3.msra.mxu0 %v2012_v0  ;;  %2558 = vmatprep.subr.mxu1 %v2032_v21 }
 0x1f9   : > { %2527 = vmatprep.subr.mxu0 %v2011_v1  ;;  %2559 = vmatpush3.msra.mxu1 %v2032_v21  ;;  %v2042_v21 = vld [vmem:[%s3407_s12 + $0x118] sm:$0xff] }
 0x1fa   : > { %2528 = vmatpush3.msra.mxu0 %v2011_v1  ;;  %2560 = vmatprep.subr.mxu1 %v2031_v23 }
 0x1fb   : > { %2529 = vmatprep.subr.mxu0 %v2010_v2  ;;  %2561 = vmatpush3.msra.mxu1 %v2031_v23  ;;  %v2040_v23 = vld [vmem:[%s3407_s12 + $0x108] sm:$0xff] }
 0x1fc   : > { %2530 = vmatpush3.msra.mxu0 %v2010_v2  ;;  %2562 = vmatprep.subr.mxu1 %v2030_v25 }
 0x1fd   : > { %2531 = vmatprep.subr.mxu0 %v2009_v3  ;;  %2563 = vmatpush3.msra.mxu1 %v2030_v25 }
 0x1fe   : > { %2532 = vmatpush3.msra.mxu0 %v2009_v3  ;;  %2564 = vmatprep.subr.mxu1 %v2029_v28 }
 0x1ff   : > { %2533 = vmatprep.subr.mxu0 %v2008_v4  ;;  %2565 = vmatpush3.msra.mxu1 %v2029_v28 }
 0x200   : > { %2534 = vmatpush3.msra.mxu0 %v2008_v4  ;;  %2566 = vmatprep.subr.mxu1 %v2028_v30 }
 0x201   : > { %2535 = vmatprep.subr.mxu0 %v2007_v5  ;;  %2567 = vmatpush3.msra.mxu1 %v2028_v30 }
 0x202   : > { %2536 = vmatpush3.msra.mxu0 %v2007_v5  ;;  %2568 = vmatprep.subr.mxu1 %v2027_v32 }
 0x203   : > { %2537 = vmatprep.subr.mxu0 %v2006_v6  ;;  %2569 = vmatpush3.msra.mxu1 %v2027_v32  ;;  %v2056_v32 = vld [vmem:[%s3408_s13] ss:$0 sm:$0xff] }
 0x204   : > { %2538 = vmatpush3.msra.mxu0 %v2006_v6  ;;  %2570 = vmatprep.subr.mxu1 %v2026_v33 }
 0x205   : > { %2539 = vmatprep.subr.mxu0 %v2005_v7  ;;  %2571 = vmatpush3.msra.mxu1 %v2026_v33 }
 0x206   : > { %2540 = vmatpush3.msra.mxu0 %v2005_v7  ;;  %2572 = vmatprep.subr.mxu1 %v2025_v35  ;;  %v2053_v7 = vld [vmem:[%s3407_s12 + $0x170] sm:$0xff] }
 0x207   : > { %2541 = vmatprep.subr.mxu0 %v2004_v8  ;;  %2573 = vmatpush3.msra.mxu1 %v2025_v35  ;;  %v2057_v35 = vld [vmem:[%s3409_s14] ss:$0 sm:$0xff] }
 0x208   : > { %2542 = vmatpush3.msra.mxu0 %v2004_v8  ;;  %2574 = vmatprep.subr.mxu1 %v2024_v37 }
 0x209   : > { %2543 = vmatprep.subr.mxu0 %v2003_v9  ;;  %2575 = vmatpush3.msra.mxu1 %v2024_v37 }
 0x20a   : > { %2544 = vmatpush3.msra.mxu0 %v2003_v9  ;;  %2576 = vmatprep.subr.mxu1 %v2023_v39 }
 0x20b   : > { %2545 = vmatprep.subr.mxu0 %v2002_v11  ;;  %2577 = vmatpush3.msra.mxu1 %v2023_v39 }
 0x20c   : > { %2546 = vmatpush3.msra.mxu0 %v2002_v11  ;;  %2578 = vmatprep.subr.mxu1 %v2022_v41  ;;  %v2052_v11 = vld [vmem:[%s3407_s12 + $0x168] sm:$0xff] }
 0x20d   : > { %2548 = vmatmul.mubr.msk.f32.vlgmr.msra.gmra.mxu0 %vm505_vm2, %v1225_v58  ;;  %2585 = vmatprep.subr.mxu0 %v1560_v15 }
 0x20e   : > { %2586 = vmatpush3.msra.mxu0 %v1560_v15  ;;  %2579 = vmatpush3.msra.mxu1 %v2022_v41  ;;  %v2048_v15 = vld [vmem:[%s3407_s12 + $0x148] sm:$0xff] }
 0x20f   : > { %2587 = vmatprep.subr.mxu0 %v1559_v16  ;;  %2580 = vmatprep.subr.mxu1 %v2021_v43 }
 0x210   : > { %2588 = vmatpush3.msra.mxu0 %v1559_v16  ;;  %2581 = vmatpush3.msra.mxu1 %v2021_v43  ;;  %v2047_v16 = vld [vmem:[%s3407_s12 + $0x140] sm:$0xff] }
 0x211   : > { %2589 = vmatprep.subr.mxu0 %v1558_v18  ;;  %2620 = vmatprep.subr.mxu1 %v2054_v45 }
 0x212   : > { %2590 = vmatpush3.msra.mxu0 %v1558_v18  ;;  %v2045_v18 = vld [vmem:[%s3407_s12 + $0x130] sm:$0xff] }
 0x213   : > { %2591 = vmatprep.subr.mxu0 %v1557_v20 }
 0x214   : > { %2592 = vmatpush3.msra.mxu0 %v1557_v20  ;;  %v2043_v20 = vld [vmem:[%s3407_s12 + $0x120] sm:$0xff] }
 0x215   : > { %2593 = vmatprep.subr.mxu0 %v1556_v22 }
 0x216   : > { %2594 = vmatpush3.msra.mxu0 %v1556_v22  ;;  %v2041_v22 = vld [vmem:[%s3407_s12 + $0x110] sm:$0xff] }
 0x217   : > { %2595 = vmatprep.subr.mxu0 %v1555_v24 }
 0x218   : > { %2596 = vmatpush3.msra.mxu0 %v1555_v24  ;;  %v2039_v24 = vld [vmem:[%s3407_s12 + $0x100] sm:$0xff] }
 0x219   : > { %2597 = vmatprep.subr.mxu0 %v1554_v27 }
 0x21a   : > { %2598 = vmatpush3.msra.mxu0 %v1554_v27 }
 0x21b   : > { %2599 = vmatprep.subr.mxu0 %v1553_v29 }
 0x21c   : > { %2600 = vmatpush3.msra.mxu0 %v1553_v29 }
 0x21d   : > { %2601 = vmatprep.subr.mxu0 %v1552_v31 }
 0x21e   : > { %2602 = vmatpush3.msra.mxu0 %v1552_v31 }
 0x21f   : > { %2603 = vmatprep.subr.mxu0 %v1551_v34 }
 0x220   : > { %2604 = vmatpush3.msra.mxu0 %v1551_v34 }
 0x221   : > { %2605 = vmatprep.subr.mxu0 %v1550_v36 }
 0x222   : > { %2606 = vmatpush3.msra.mxu0 %v1550_v36 }
 0x223   : > { %2607 = vmatprep.subr.mxu0 %v1549_v38 }
 0x224   : > { %2608 = vmatpush3.msra.mxu0 %v1549_v38 }
 0x225   : > { %2609 = vmatprep.subr.mxu0 %v1548_v40 }
 0x226   : > { %2610 = vmatpush3.msra.mxu0 %v1548_v40 }
 0x227   : > { %2611 = vmatprep.subr.mxu0 %v1547_v42 }
 0x228   : > { %2612 = vmatpush3.msra.mxu0 %v1547_v42 }
 0x229   : > { %2613 = vmatprep.subr.mxu0 %v1546_v44 }
 0x22a   : > { %2614 = vmatpush3.msra.mxu0 %v1546_v44 }
 0x22b   : > { %2615 = vmatprep.subr.mxu0 %v1545_v46 }
 0x22c   : > { %2616 = vmatpush3.msra.mxu0 %v1545_v46 }
 0x2ad   : > { %v2479_v47 = vpop.f32.mrf.mxu0 }
 0x2af   : > { %v2514_v48 = vpop.f32.mrf.mxu1  ;;  %v1329_v49 = vpop.f32.mrf.mxu0 }
 0x2b0   : > { %v1410_v51 = vadd.f32 %v2514_v48, %v2479_v47 }
 0x2b1   : > { %v1404_v50 = vpop.f32.mrf.mxu1 }
 0x2b2   : > { %v1405_v54 = vadd.f32 %v1404_v50, %v1329_v49 }
 0x2cd   : > { %v2549_v52 = vpop.f32.mrf.mxu0 }
 0x2ce   : > { %v1506_v55 = vadd.f32 %v2549_v52, %v1410_v51 }
 0x2cf   : > { %v1496_v57 = vpop.f32.mrf.mxu0 }
 0x2d0   : > { %v1515_v58 = vmul.f32 %v2019_v10, %v1506_v55  ;;  %v1505_v59 = vadd.f32 %v1496_v57, %v1405_v54 }
 0x2d2   : > { %v1524_v60 = vadd.f32 %v2020_v56, %v1515_v58  ;;  %v1514_v61 = vmul.f32 %v2019_v10, %v1505_v59 }
 0x2d4   : > { %v1523_v62 = vadd.f32 %v2020_v56, %v1514_v61  ;;  %vm1526_vm10 = vcmp.gt.f32.partialorder %v1524_v60, 0.0  ;;  %v1528_v63 = vmul.f32 0.01, %v1524_v60 }
 0x2d6   : > { %vm1525_vm11 = vcmp.gt.f32.partialorder %v1523_v62, 0.0  ;;  %v1527_v0 = vmul.f32 0.01, %v1523_v62  ;;  %v1530_v1 = vsel %vm1526_vm10, %v1524_v60, %v1528_v63 }
 0x2d7   : > { %v1534_v5 = vrot.slane %v1530_v1, 7  ;;  %v1540_v6 = vrot.slane %v1530_v1, 1 }
 0x2d8   : > { %v1529_v2 = vsel %vm1525_vm11, %v1523_v62, %v1527_v0 }
 0x2d9   : > { %v1533_v3 = vrot.slane %v1529_v2, 7  ;;  %v1539_v4 = vrot.slane %v1529_v2, 1  ;;  %2582 = vmatprep.mubr.f32.mxu1 %v1529_v2 }
 0x2da   : > { %2583 = vmatmul.mubr.f32.vlgmr.msra.gmra.mxu1 %v1530_v1 }
 0x2db   : > { %2621 = vmatpush3.msra.mxu1 %v2054_v45  ;;  %2617 = vmatprep.mubr.msk.f32.mxu0 %vm2970_vm5, %v1533_v3  ;;  %v1535_v8 = vsel %vm499_vm0, %v1533_v3, %v1534_v5  ;;  %v1541_v9 = vsel %vm505_vm2, %v1539_v4, %v1540_v6 }
 0x2dc   : > { %2622 = vmatprep.subr.mxu1 %v2053_v7  ;;  %2618 = vmatmul.mubr.f32.vlgmr.msra.gmra.mxu0 %v1535_v8 }
 0x2dd   : > { %2623 = vmatpush3.msra.mxu1 %v2053_v7  ;;  %2652 = vmatprep.mubr.f32.mxu1 %v1541_v9 }
 0x2de   : > { %2624 = vmatprep.subr.mxu1 %v2052_v11 }
 0x2df   : > { %2625 = vmatpush3.msra.mxu1 %v2052_v11 }
 0x2e0   : > { %2626 = vmatprep.subr.mxu1 %v2051_v12 }
 0x2e1   : > { %2627 = vmatpush3.msra.mxu1 %v2051_v12 }
 0x2e2   : > { %2628 = vmatprep.subr.mxu1 %v2050_v26 }
 0x2e3   : > { %2629 = vmatpush3.msra.mxu1 %v2050_v26 }
 0x2e4   : > { %2630 = vmatprep.subr.mxu1 %v2049_v14 }
 0x2e5   : > { %2631 = vmatpush3.msra.mxu1 %v2049_v14 }
 0x2e6   : > { %2632 = vmatprep.subr.mxu1 %v2048_v15 }
 0x2e7   : > { %2633 = vmatpush3.msra.mxu1 %v2048_v15 }
 0x2e8   : > { %2634 = vmatprep.subr.mxu1 %v2047_v16 }
 0x2e9   : > { %2635 = vmatpush3.msra.mxu1 %v2047_v16 }
 0x2ea   : > { %2636 = vmatprep.subr.mxu1 %v2046_v17 }
 0x2eb   : > { %2637 = vmatpush3.msra.mxu1 %v2046_v17 }
 0x2ec   : > { %2638 = vmatprep.subr.mxu1 %v2045_v18 }
 0x2ed   : > { %2639 = vmatpush3.msra.mxu1 %v2045_v18 }
 0x2ee   : > { %2640 = vmatprep.subr.mxu1 %v2044_v19 }
 0x2ef   : > { %2641 = vmatpush3.msra.mxu1 %v2044_v19 }
 0x2f0   : > { %2642 = vmatprep.subr.mxu1 %v2043_v20 }
 0x2f1   : > { %2643 = vmatpush3.msra.mxu1 %v2043_v20 }
 0x2f2   : > { %2644 = vmatprep.subr.mxu1 %v2042_v21 }
 0x2f3   : > { %2645 = vmatpush3.msra.mxu1 %v2042_v21 }
 0x2f4   : > { %2646 = vmatprep.subr.mxu1 %v2041_v22 }
 0x2f5   : > { %2647 = vmatpush3.msra.mxu1 %v2041_v22 }
 0x2f6   : > { %2648 = vmatprep.subr.mxu1 %v2040_v23 }
 0x2f7   : > { %2649 = vmatpush3.msra.mxu1 %v2040_v23 }
 0x2f8   : > { %2650 = vmatprep.subr.mxu1 %v2039_v24 }
 0x2f9   : > { %2651 = vmatpush3.msra.mxu1 %v2039_v24 }
 0x2fa   : > { %2653 = vmatmul.mubr.msk.f32.vlgmr.msra.gmra.mxu1 %vm505_vm2, %v1540_v6 }
 0x39a   : > { %v2584_v25 = vpop.f32.mrf.mxu1 }
 0x39c   : > { %v2619_v27 = vpop.f32.mrf.mxu0  ;;  %v1644_v28 = vpop.f32.mrf.mxu1 }
 0x39d   : > { %v1725_v30 = vadd.f32 %v2619_v27, %v2584_v25 }
 0x39e   : > { %v1719_v29 = vpop.f32.mrf.mxu0 }
 0x39f   : > { %v1720_v33 = vadd.f32 %v1719_v29, %v1644_v28 }
 0x3ba   : > { %v2654_v31 = vpop.f32.mrf.mxu1 }
 0x3bb   : > { %v1821_v34 = vadd.f32 %v2654_v31, %v1725_v30 }
 0x3bc   : > { %v1811_v36 = vpop.f32.mrf.mxu1 }
 0x3bd   : > { %v1830_v37 = vmul.f32 %v2056_v32, %v1821_v34  ;;  %v1820_v38 = vadd.f32 %v1811_v36, %v1720_v33 }
 0x3bf   : > { %v1839_v39 = vadd.f32 %v2057_v35, %v1830_v37  ;;  %v1829_v40 = vmul.f32 %v2056_v32, %v1820_v38 }
 0x3c1   : > { %vm1841_vm12 = vcmp.gt.f32.partialorder %v1839_v39, 0.0  ;;  %v1843_v41 = vmul.f32 0.01, %v1839_v39  ;;  %v1838_v42 = vadd.f32 %v2057_v35, %v1829_v40 }
 0x3c3   : > { %v1845_v43 = vsel %vm1841_vm12, %v1839_v39, %v1843_v41  ;;  %vm1840_vm13 = vcmp.gt.f32.partialorder %v1838_v42, 0.0  ;;  %v1842_v44 = vmul.f32 0.01, %v1838_v42 }
 0x3c4   : > { %v1847_v45 = vadd.f32 %v1845_v43, %v3164_v13 }
 0x3c5   : > { %v1844_v46 = vsel %vm1840_vm13, %v1838_v42, %v1842_v44 }
 0x3c6   : > { %vm1849_vm14 = vcmp.gt.f32.partialorder %v1847_v45, 0.0  ;;  %v1851_v47 = vmul.f32 0.01, %v1847_v45  ;;  %v1846_v48 = vadd.f32 %v1844_v46, %v3166_v53 }
 0x3c8   : > { %v1853_v49 = vsel %vm1849_vm14, %v1847_v45, %v1851_v47  ;;  %vm1848_vm15 = vcmp.gt.f32.partialorder %v1846_v48, 0.0  ;;  %v1850_v50 = vmul.f32 0.01, %v1846_v48 }
 0x3c9   : > { %1855 = vst [vmem:[%s494_s22 + $0x8] sm:$0xff] %v1853_v49 }
 0x3ca   : > { %v1852_v51 = vsel %vm1848_vm15, %v1846_v48, %v1850_v50 }
 0x3cb   : > { %1854 = vst [vmem:[%s494_s22] sm:$0xff] %v1852_v51 }
 0x3cc PF: > { %s25_s18 = sadd.s32 1, %s2669_s18  }
 0x3cd   : > { %p22_p4 = scmp.ge.s32.totalorder %s25_s18, 4  }
 0x3cf   :  { %24 = sbr.rel (!%p22_p4) target bundleno = 1 (0x1), region = 118 }

</bundles_post_ra>
